<compile_context>
chip_gen: v7x
topology: tpu7x:2x2x1
jax: 0.10.0
libtpu: 0.0.40
codegen_flags: <defaults>
</compile_context>

<pallas_src>
import functools

import jax
import jax.numpy as jnp
from jax.experimental import pallas as pl
from jax.experimental.pallas import tpu as pltpu

NEG_INF = -1e30
NEG_SLOPE = 0.2  # GATConv default negative_slope


# ----------------------------------------------------------------------------
# Fused Pallas kernel: 3x (GATConv + ReLU) -> mean/max pool -> Linear
# ----------------------------------------------------------------------------
def _gat_forward_kernel(x_ref, bias_ref, ws_ref, b_conv_ref, w_out_ref, b_out_ref,
                        out_ref, *, num_graphs, nodes_per_graph, hidden):
    """Shapes (Hp = padded hidden = 128, Cp = padded classes = 128):

    x:[N,Hp](bf16)  bias:[N,N](f32, additive mask: 0 edge / -1e30 non-edge)
    ws:[3,Hp,Hp](bf16, cols `hidden`,`hidden+1` hold W@a_src^T, W@a_dst^T)
    b_conv:[3,1,Hp](f32)  w_out:[2*Hp,Cp](bf16)  b_out:[1,Cp](f32)  out:[B,Cp](f32)
    """
    attn_bias = bias_ref[...]                                          # [N, N] f32, loaded once

    h = x_ref[...]                                                     # bf16 [N, Hp]
    hf = None
    for layer in range(3):                                             # static unroll
        w = ws_ref[layer]                                              # bf16 [Hp, Hp]
        hf = jnp.dot(h, w, preferred_element_type=jnp.float32)         # f32 [N, Hp] (MXU bf16)

        # Attention coefficients were folded into padded weight columns:
        # hf[:, hidden]   = h @ (W @ a_src^T) = (h @ W) . a_src
        # hf[:, hidden+1] = h @ (W @ a_dst^T) = (h @ W) . a_dst
        a_src = hf[:, hidden:hidden + 1]                               # [N, 1]
        a_dst = hf[:, hidden + 1:hidden + 2]                           # [N, 1]

        # e[i, j] = leaky_relu(a_dst[i] + a_src[j])   (edge j -> i)
        e = a_dst + a_src.T                                            # [N, N] f32
        e = jnp.where(e > 0, e, NEG_SLOPE * e)

        # masked softmax over source nodes j (per target i): additive bias mask
        logits = e + attn_bias
        m = jnp.max(logits, axis=-1, keepdims=True)
        p = jnp.exp(logits - m)
        denom = jnp.sum(p, axis=-1, keepdims=True)
        attn = p * pl.reciprocal(denom, approx=True)                   # EUP recip, not VALU div

        hf = (jnp.dot(attn.astype(jnp.bfloat16), hf.astype(jnp.bfloat16),
                      preferred_element_type=jnp.float32)
              + b_conv_ref[layer])                                     # f32 [N, Hp]
        hf = jnp.maximum(hf, 0.0)                                      # fused ReLU
        h = hf.astype(jnp.bfloat16)

    # --- global mean/max pool: equal-sized contiguous graphs, sublane-aligned
    #     reshape (nodes_per_graph % 8 == 0), both in f32 ---
    h3 = hf.reshape(num_graphs, nodes_per_graph, hf.shape[-1])         # [B, n, Hp]
    mean = jnp.mean(h3, axis=1)                                        # [B, Hp]
    mx = jnp.max(h3, axis=1)                                           # [B, Hp]

    # --- Linear(2H -> C): single K = 2*Hp = 256 matmul, lane-dense [B, Cp] ---
    pooled = jnp.concatenate([mean, mx], axis=-1).astype(jnp.bfloat16)  # [B, 2*Hp]
    out_ref[...] = (jnp.dot(pooled, w_out_ref[...],
                            preferred_element_type=jnp.float32)
                    + b_out_ref[...])


# ----------------------------------------------------------------------------
# Wrapper (all pad/cast work is done once in prepare_* / pack_params, not here)
# ----------------------------------------------------------------------------
def gat_forward(x_pad, attn_bias, packed, *, num_graphs, nodes_per_graph, num_classes):
    n = x_pad.shape[0]
    assert n == num_graphs * nodes_per_graph, "graphs must be equal-sized & contiguous"
    assert nodes_per_graph % 8 == 0, "pooling reshape requires sublane-aligned graphs"
    assert n % 8 == 0 and num_graphs % 8 == 0 or num_graphs >= 1
    cpad = packed["w_out"].shape[-1]

    kernel = functools.partial(_gat_forward_kernel, num_graphs=num_graphs,
                               nodes_per_graph=nodes_per_graph, hidden=packed["hidden"])
    vmem = pl.BlockSpec(memory_space=pltpu.MemorySpace.VMEM)
    out_pad = pl.pallas_call(
        kernel,
        out_shape=jax.ShapeDtypeStruct((num_graphs, cpad), jnp.float32),
        in_specs=[vmem] * 6,
        out_specs=vmem,
    )(x_pad, attn_bias, packed["ws"], packed["b_conv"], packed["w_out"], packed["b_out"])

    return out_pad[:, :num_classes]                                    # [B, num_classes]


def prepare_node_features(x, hidden_pad=128):
    """Pad node features to the lane-dense channel width and cast for the MXU.
    Hoisted out of the per-call path (do once)."""
    return jnp.pad(x, ((0, 0), (0, hidden_pad - x.shape[1]))).astype(jnp.bfloat16)


# ----------------------------------------------------------------------------
# Deterministic parameter / input construction
# ----------------------------------------------------------------------------
def init_params(key, num_features, hidden, num_classes):
    params = {"convs": []}
    fin = num_features
    for _ in range(3):  # initial_conv, conv1, conv2
        key, k1, k2, k3 = jax.random.split(key, 4)
        w = jax.random.normal(k1, (fin, hidden), jnp.float32) / jnp.sqrt(float(fin))
        a_src = jax.random.normal(k2, (1, hidden), jnp.float32) * 0.1
        a_dst = jax.random.normal(k3, (1, hidden), jnp.float32) * 0.1
        bias = jnp.zeros((1, hidden), jnp.float32)
        params["convs"].append((w, a_src, a_dst, bias))
        fin = hidden
    key, k1, k2 = jax.random.split(key, 3)
    # nn.Linear(2H, C): the (2H, C) matrix split into mean- and max-pool halves.
    params["w_mean"] = jax.random.normal(k1, (hidden, num_classes), jnp.float32) / jnp.sqrt(2.0 * hidden)
    params["w_max"] = jax.random.normal(k2, (hidden, num_classes), jnp.float32) / jnp.sqrt(2.0 * hidden)
    params["b_out"] = jnp.zeros((1, num_classes), jnp.float32)
    params["hidden"] = hidden
    return params


def pack_params(params, hidden_pad=128, class_pad=128):
    """Zero-pad every weight to lane-dense 128-wide tiles, stack the 3 conv
    layers, fold the attention vectors into padded weight columns, stack the
    classifier halves into one [2*Hp, Cp] weight, and cast MXU operands to bf16.

    Folding: (h @ W) . a == h @ (W @ a^T), so columns `hidden` / `hidden+1` of
    the padded W hold W @ a_src^T / W @ a_dst^T. Rows >= hidden of every
    downstream weight are zero, so the junk these columns produce in the hidden
    state never reaches real outputs."""
    hidden = params["hidden"]
    assert hidden + 2 <= hidden_pad

    def pad2(a, r, c):
        return jnp.zeros((r, c), a.dtype).at[:a.shape[0], :a.shape[1]].set(a)

    ws, bs = [], []
    for (w, s, d, b) in params["convs"]:
        fin = w.shape[0]
        wp = pad2(w, hidden_pad, hidden_pad)
        wp = wp.at[:fin, hidden].set((w @ s.T)[:, 0])       # folded a_src projection
        wp = wp.at[:fin, hidden + 1].set((w @ d.T)[:, 0])   # folded a_dst projection
        ws.append(wp)
        bs.append(pad2(b, 1, hidden_pad))

    w_out = jnp.concatenate(
        [pad2(params["w_mean"], hidden_pad, class_pad),
         pad2(params["w_max"], hidden_pad, class_pad)], axis=0)        # [2*Hp, Cp]

    return {
        "ws": jnp.stack(ws).astype(jnp.bfloat16),          # [3, Hp, Hp]
        "b_conv": jnp.stack(bs),                           # [3, 1, Hp] f32
        "w_out": w_out.astype(jnp.bfloat16),               # [2*Hp, Cp] bf16
        "b_out": pad2(params["b_out"], 1, class_pad),      # [1, Cp] f32
        "hidden": hidden,
    }


def build_graph(num_graphs, nodes_per_graph):
    """Bidirectional ring per graph + self loops (GATConv default).
    Returns edge_index and the precomputed ADDITIVE attention-mask bias."""
    n = num_graphs * nodes_per_graph
    src, dst = [], []
    for g in range(num_graphs):
        base = g * nodes_per_graph
        for i in range(nodes_per_graph):
            a, b = base + i, base + (i + 1) % nodes_per_graph
            src += [a, b]
            dst += [b, a]
    edge_index = jnp.array([src, dst], dtype=jnp.int32)                  # [2, E]
    adj = jnp.zeros((n, n), jnp.float32)
    adj = adj.at[edge_index[1], edge_index[0]].set(1.0)                  # edge j -> i
    adj = adj.at[jnp.arange(n), jnp.arange(n)].set(1.0)                  # self loops
    attn_bias = jnp.where(adj > 0, 0.0, NEG_INF).astype(jnp.float32)     # additive mask
    return edge_index, attn_bias


if __name__ == "__main__":
    # 16 graphs x 8 nodes -> N = 128: lane-dense [N,N] attention tiles, K=128
    # value matmuls, sublane-aligned pooling reshape, B=16 output rows.
    NUM_GRAPHS = 16
    NODES_PER_GRAPH = 8
    NUM_FEATURES = 8
    HIDDEN = 64
    NUM_CLASSES = 4

    key = jax.random.PRNGKey(0)
    key, kx, kp = jax.random.split(key, 3)

    N = NUM_GRAPHS * NODES_PER_GRAPH
    x = jax.random.normal(kx, (N, NUM_FEATURES), jnp.float32)
    edge_index, attn_bias = build_graph(NUM_GRAPHS, NODES_PER_GRAPH)
    params = init_params(kp, NUM_FEATURES, HIDDEN, NUM_CLASSES)

    # Hoisted one-time preprocessing (not in the per-call path).
    packed = pack_params(params)
    x_pad = prepare_node_features(x, hidden_pad=packed["ws"].shape[-1])

    out = gat_forward(x_pad, attn_bias, packed,
                      num_graphs=NUM_GRAPHS, nodes_per_graph=NODES_PER_GRAPH,
                      num_classes=NUM_CLASSES)
    jax.block_until_ready(out)
    assert out.shape == (NUM_GRAPHS, NUM_CLASSES)
    print("KERNEL_OK")
</pallas_src>

<mosaic_0001>
module attributes {stable_mosaic.version = 11 : i64} {
  func.func @_gat_forward_kernel(%arg0: memref<128x128xbf16, #tpu.memory_space<vmem>>, %arg1: memref<128x128xf32, #tpu.memory_space<vmem>>, %arg2: memref<3x128x128xbf16, #tpu.memory_space<vmem>>, %arg3: memref<3x1x128xf32, #tpu.memory_space<vmem>>, %arg4: memref<256x128xbf16, #tpu.memory_space<vmem>>, %arg5: memref<1x128xf32, #tpu.memory_space<vmem>>, %arg6: memref<16x128xf32, #tpu.memory_space<vmem>>) attributes {dimension_semantics = [], scalar_prefetch = 0 : i64, scratch_operands = 0 : i64, tpu.core_type = #tpu.core_type<tc>} {
    %c0 = arith.constant 0 : index
    %c0_0 = arith.constant 0 : index
    %0 = vector.load %arg1[%c0, %c0_0] : memref<128x128xf32, #tpu.memory_space<vmem>>, vector<128x128xf32>
    %c0_1 = arith.constant 0 : index
    %c0_2 = arith.constant 0 : index
    %1 = vector.load %arg0[%c0_1, %c0_2] : memref<128x128xbf16, #tpu.memory_space<vmem>>, vector<128x128xbf16>
    %c0_3 = arith.constant 0 : index
    %c0_4 = arith.constant 0 : index
    %c0_5 = arith.constant 0 : index
    %2 = vector.load %arg2[%c0_3, %c0_4, %c0_5] : memref<3x128x128xbf16, #tpu.memory_space<vmem>>, vector<1x128x128xbf16>
    %3 = vector.shape_cast %2 : vector<1x128x128xbf16> to vector<128x128xbf16>
    %cst = arith.constant dense<0.000000e+00> : vector<128x128xf32>
    %4 = tpu.matmul %1, %3, %cst {dimension_numbers = #tpu.dot_dimension_numbers<[1], [0], [0], [1], [0, 0, 1, 1], [], []>} : vector<128x128xbf16>, vector<128x128xbf16>, vector<128x128xf32> -> vector<128x128xf32>
    %5 = vector.extract_strided_slice %4 {offsets = [0, 64], sizes = [128, 1], strides = [1, 1]} : vector<128x128xf32> to vector<128x1xf32>
    %6 = vector.extract_strided_slice %4 {offsets = [0, 65], sizes = [128, 1], strides = [1, 1]} : vector<128x128xf32> to vector<128x1xf32>
    %7 = tpu.transpose %5, [1, 0] : vector<128x1xf32> -> vector<1x128xf32>
    %8 = vector.broadcast %6 : vector<128x1xf32> to vector<128x128xf32>
    %9 = vector.broadcast %7 : vector<1x128xf32> to vector<128x128xf32>
    %10 = arith.addf %8, %9 : vector<128x128xf32>
    %cst_6 = arith.constant 0.000000e+00 : f32
    %11 = vector.broadcast %cst_6 : f32 to vector<128x128xf32>
    %12 = arith.cmpf ogt, %10, %11 : vector<128x128xf32>
    %cst_7 = arith.constant 2.000000e-01 : f32
    %13 = vector.broadcast %cst_7 : f32 to vector<128x128xf32>
    %14 = arith.mulf %13, %10 : vector<128x128xf32>
    %15 = arith.select %12, %10, %14 : vector<128x128xi1>, vector<128x128xf32>
    %16 = arith.addf %15, %0 : vector<128x128xf32>
    %cst_8 = arith.constant dense<0xFF800000> : vector<128xf32>
    %17 = vector.multi_reduction <maximumf>, %16, %cst_8 [1] : vector<128x128xf32> to vector<128xf32>
    %18 = vector.shape_cast %17 : vector<128xf32> to vector<128x1xf32>
    %19 = vector.broadcast %18 : vector<128x1xf32> to vector<128x128xf32>
    %20 = arith.subf %16, %19 : vector<128x128xf32>
    %21 = math.exp %20 : vector<128x128xf32>
    %cst_9 = arith.constant dense<0.000000e+00> : vector<128xf32>
    %22 = vector.multi_reduction <add>, %21, %cst_9 [1] : vector<128x128xf32> to vector<128xf32>
    %23 = vector.shape_cast %22 : vector<128xf32> to vector<128x1xf32>
    %24 = tpu.reciprocal %23 {approx = true} : vector<128x1xf32> -> vector<128x1xf32>
    %25 = vector.broadcast %24 : vector<128x1xf32> to vector<128x128xf32>
    %26 = arith.mulf %21, %25 : vector<128x128xf32>
    %27 = arith.truncf %26 : vector<128x128xf32> to vector<128x128xbf16>
    %28 = arith.truncf %4 : vector<128x128xf32> to vector<128x128xbf16>
    %cst_10 = arith.constant dense<0.000000e+00> : vector<128x128xf32>
    %29 = tpu.matmul %27, %28, %cst_10 {dimension_numbers = #tpu.dot_dimension_numbers<[1], [0], [0], [1], [0, 0, 1, 1], [], []>} : vector<128x128xbf16>, vector<128x128xbf16>, vector<128x128xf32> -> vector<128x128xf32>
    %c0_11 = arith.constant 0 : index
    %c0_12 = arith.constant 0 : index
    %c0_13 = arith.constant 0 : index
    %30 = vector.load %arg3[%c0_11, %c0_12, %c0_13] : memref<3x1x128xf32, #tpu.memory_space<vmem>>, vector<1x1x128xf32>
    %31 = vector.shape_cast %30 : vector<1x1x128xf32> to vector<1x128xf32>
    %32 = vector.broadcast %31 : vector<1x128xf32> to vector<128x128xf32>
    %33 = arith.addf %29, %32 : vector<128x128xf32>
    %cst_14 = arith.constant 0.000000e+00 : f32
    %34 = vector.broadcast %cst_14 : f32 to vector<128x128xf32>
    %35 = arith.maximumf %33, %34 : vector<128x128xf32>
    %36 = arith.truncf %35 : vector<128x128xf32> to vector<128x128xbf16>
    %c1 = arith.constant 1 : index
    %c0_15 = arith.constant 0 : index
    %c0_16 = arith.constant 0 : index
    %37 = vector.load %arg2[%c1, %c0_15, %c0_16] : memref<3x128x128xbf16, #tpu.memory_space<vmem>>, vector<1x128x128xbf16>
    %38 = vector.shape_cast %37 : vector<1x128x128xbf16> to vector<128x128xbf16>
    %cst_17 = arith.constant dense<0.000000e+00> : vector<128x128xf32>
    %39 = tpu.matmul %36, %38, %cst_17 {dimension_numbers = #tpu.dot_dimension_numbers<[1], [0], [0], [1], [0, 0, 1, 1], [], []>} : vector<128x128xbf16>, vector<128x128xbf16>, vector<128x128xf32> -> vector<128x128xf32>
    %40 = vector.extract_strided_slice %39 {offsets = [0, 64], sizes = [128, 1], strides = [1, 1]} : vector<128x128xf32> to vector<128x1xf32>
    %41 = vector.extract_strided_slice %39 {offsets = [0, 65], sizes = [128, 1], strides = [1, 1]} : vector<128x128xf32> to vector<128x1xf32>
    %42 = tpu.transpose %40, [1, 0] : vector<128x1xf32> -> vector<1x128xf32>
    %43 = vector.broadcast %41 : vector<128x1xf32> to vector<128x128xf32>
    %44 = vector.broadcast %42 : vector<1x128xf32> to vector<128x128xf32>
    %45 = arith.addf %43, %44 : vector<128x128xf32>
    %cst_18 = arith.constant 0.000000e+00 : f32
    %46 = vector.broadcast %cst_18 : f32 to vector<128x128xf32>
    %47 = arith.cmpf ogt, %45, %46 : vector<128x128xf32>
    %cst_19 = arith.constant 2.000000e-01 : f32
    %48 = vector.broadcast %cst_19 : f32 to vector<128x128xf32>
    %49 = arith.mulf %48, %45 : vector<128x128xf32>
    %50 = arith.select %47, %45, %49 : vector<128x128xi1>, vector<128x128xf32>
    %51 = arith.addf %50, %0 : vector<128x128xf32>
    %cst_20 = arith.constant dense<0xFF800000> : vector<128xf32>
    %52 = vector.multi_reduction <maximumf>, %51, %cst_20 [1] : vector<128x128xf32> to vector<128xf32>
    %53 = vector.shape_cast %52 : vector<128xf32> to vector<128x1xf32>
    %54 = vector.broadcast %53 : vector<128x1xf32> to vector<128x128xf32>
    %55 = arith.subf %51, %54 : vector<128x128xf32>
    %56 = math.exp %55 : vector<128x128xf32>
    %cst_21 = arith.constant dense<0.000000e+00> : vector<128xf32>
    %57 = vector.multi_reduction <add>, %56, %cst_21 [1] : vector<128x128xf32> to vector<128xf32>
    %58 = vector.shape_cast %57 : vector<128xf32> to vector<128x1xf32>
    %59 = tpu.reciprocal %58 {approx = true} : vector<128x1xf32> -> vector<128x1xf32>
    %60 = vector.broadcast %59 : vector<128x1xf32> to vector<128x128xf32>
    %61 = arith.mulf %56, %60 : vector<128x128xf32>
    %62 = arith.truncf %61 : vector<128x128xf32> to vector<128x128xbf16>
    %63 = arith.truncf %39 : vector<128x128xf32> to vector<128x128xbf16>
    %cst_22 = arith.constant dense<0.000000e+00> : vector<128x128xf32>
    %64 = tpu.matmul %62, %63, %cst_22 {dimension_numbers = #tpu.dot_dimension_numbers<[1], [0], [0], [1], [0, 0, 1, 1], [], []>} : vector<128x128xbf16>, vector<128x128xbf16>, vector<128x128xf32> -> vector<128x128xf32>
    %c1_23 = arith.constant 1 : index
    %c0_24 = arith.constant 0 : index
    %c0_25 = arith.constant 0 : index
    %65 = vector.load %arg3[%c1_23, %c0_24, %c0_25] : memref<3x1x128xf32, #tpu.memory_space<vmem>>, vector<1x1x128xf32>
    %66 = vector.shape_cast %65 : vector<1x1x128xf32> to vector<1x128xf32>
    %67 = vector.broadcast %66 : vector<1x128xf32> to vector<128x128xf32>
    %68 = arith.addf %64, %67 : vector<128x128xf32>
    %cst_26 = arith.constant 0.000000e+00 : f32
    %69 = vector.broadcast %cst_26 : f32 to vector<128x128xf32>
    %70 = arith.maximumf %68, %69 : vector<128x128xf32>
    %71 = arith.truncf %70 : vector<128x128xf32> to vector<128x128xbf16>
    %c2 = arith.constant 2 : index
    %c0_27 = arith.constant 0 : index
    %c0_28 = arith.constant 0 : index
    %72 = vector.load %arg2[%c2, %c0_27, %c0_28] : memref<3x128x128xbf16, #tpu.memory_space<vmem>>, vector<1x128x128xbf16>
    %73 = vector.shape_cast %72 : vector<1x128x128xbf16> to vector<128x128xbf16>
    %cst_29 = arith.constant dense<0.000000e+00> : vector<128x128xf32>
    %74 = tpu.matmul %71, %73, %cst_29 {dimension_numbers = #tpu.dot_dimension_numbers<[1], [0], [0], [1], [0, 0, 1, 1], [], []>} : vector<128x128xbf16>, vector<128x128xbf16>, vector<128x128xf32> -> vector<128x128xf32>
    %75 = vector.extract_strided_slice %74 {offsets = [0, 64], sizes = [128, 1], strides = [1, 1]} : vector<128x128xf32> to vector<128x1xf32>
    %76 = vector.extract_strided_slice %74 {offsets = [0, 65], sizes = [128, 1], strides = [1, 1]} : vector<128x128xf32> to vector<128x1xf32>
    %77 = tpu.transpose %75, [1, 0] : vector<128x1xf32> -> vector<1x128xf32>
    %78 = vector.broadcast %76 : vector<128x1xf32> to vector<128x128xf32>
    %79 = vector.broadcast %77 : vector<1x128xf32> to vector<128x128xf32>
    %80 = arith.addf %78, %79 : vector<128x128xf32>
    %cst_30 = arith.constant 0.000000e+00 : f32
    %81 = vector.broadcast %cst_30 : f32 to vector<128x128xf32>
    %82 = arith.cmpf ogt, %80, %81 : vector<128x128xf32>
    %cst_31 = arith.constant 2.000000e-01 : f32
    %83 = vector.broadcast %cst_31 : f32 to vector<128x128xf32>
    %84 = arith.mulf %83, %80 : vector<128x128xf32>
    %85 = arith.select %82, %80, %84 : vector<128x128xi1>, vector<128x128xf32>
    %86 = arith.addf %85, %0 : vector<128x128xf32>
    %cst_32 = arith.constant dense<0xFF800000> : vector<128xf32>
    %87 = vector.multi_reduction <maximumf>, %86, %cst_32 [1] : vector<128x128xf32> to vector<128xf32>
    %88 = vector.shape_cast %87 : vector<128xf32> to vector<128x1xf32>
    %89 = vector.broadcast %88 : vector<128x1xf32> to vector<128x128xf32>
    %90 = arith.subf %86, %89 : vector<128x128xf32>
    %91 = math.exp %90 : vector<128x128xf32>
    %cst_33 = arith.constant dense<0.000000e+00> : vector<128xf32>
    %92 = vector.multi_reduction <add>, %91, %cst_33 [1] : vector<128x128xf32> to vector<128xf32>
    %93 = vector.shape_cast %92 : vector<128xf32> to vector<128x1xf32>
    %94 = tpu.reciprocal %93 {approx = true} : vector<128x1xf32> -> vector<128x1xf32>
    %95 = vector.broadcast %94 : vector<128x1xf32> to vector<128x128xf32>
    %96 = arith.mulf %91, %95 : vector<128x128xf32>
    %97 = arith.truncf %96 : vector<128x128xf32> to vector<128x128xbf16>
    %98 = arith.truncf %74 : vector<128x128xf32> to vector<128x128xbf16>
    %cst_34 = arith.constant dense<0.000000e+00> : vector<128x128xf32>
    %99 = tpu.matmul %97, %98, %cst_34 {dimension_numbers = #tpu.dot_dimension_numbers<[1], [0], [0], [1], [0, 0, 1, 1], [], []>} : vector<128x128xbf16>, vector<128x128xbf16>, vector<128x128xf32> -> vector<128x128xf32>
    %c2_35 = arith.constant 2 : index
    %c0_36 = arith.constant 0 : index
    %c0_37 = arith.constant 0 : index
    %100 = vector.load %arg3[%c2_35, %c0_36, %c0_37] : memref<3x1x128xf32, #tpu.memory_space<vmem>>, vector<1x1x128xf32>
    %101 = vector.shape_cast %100 : vector<1x1x128xf32> to vector<1x128xf32>
    %102 = vector.broadcast %101 : vector<1x128xf32> to vector<128x128xf32>
    %103 = arith.addf %99, %102 : vector<128x128xf32>
    %cst_38 = arith.constant 0.000000e+00 : f32
    %104 = vector.broadcast %cst_38 : f32 to vector<128x128xf32>
    %105 = arith.maximumf %103, %104 : vector<128x128xf32>
    %106 = vector.shape_cast %105 : vector<128x128xf32> to vector<16x8x128xf32>
    %cst_39 = arith.constant dense<0.000000e+00> : vector<16x128xf32>
    %107 = vector.multi_reduction <add>, %106, %cst_39 [1] : vector<16x8x128xf32> to vector<16x128xf32>
    %cst_40 = arith.constant 8.000000e+00 : f32
    %108 = vector.broadcast %cst_40 : f32 to vector<16x128xf32>
    %109 = arith.divf %107, %108 : vector<16x128xf32>
    %cst_41 = arith.constant dense<0xFF800000> : vector<16x128xf32>
    %110 = vector.multi_reduction <maximumf>, %106, %cst_41 [1] : vector<16x8x128xf32> to vector<16x128xf32>
    %111 = tpu.concatenate %109, %110 in 1 : vector<16x128xf32>, vector<16x128xf32> -> vector<16x256xf32>
    %112 = arith.truncf %111 : vector<16x256xf32> to vector<16x256xbf16>
    %c0_42 = arith.constant 0 : index
    %c0_43 = arith.constant 0 : index
    %113 = vector.load %arg4[%c0_42, %c0_43] : memref<256x128xbf16, #tpu.memory_space<vmem>>, vector<256x128xbf16>
    %cst_44 = arith.constant dense<0.000000e+00> : vector<16x128xf32>
    %114 = tpu.matmul %112, %113, %cst_44 {dimension_numbers = #tpu.dot_dimension_numbers<[1], [0], [0], [1], [0, 0, 1, 1], [], []>} : vector<16x256xbf16>, vector<256x128xbf16>, vector<16x128xf32> -> vector<16x128xf32>
    %c0_45 = arith.constant 0 : index
    %c0_46 = arith.constant 0 : index
    %115 = vector.load %arg5[%c0_45, %c0_46] : memref<1x128xf32, #tpu.memory_space<vmem>>, vector<1x128xf32>
    %116 = vector.broadcast %115 : vector<1x128xf32> to vector<16x128xf32>
    %117 = arith.addf %114, %116 : vector<16x128xf32>
    %c0_47 = arith.constant 0 : index
    %c0_48 = arith.constant 0 : index
    %118 = vector.load %arg6[%c0_47, %c0_48] : memref<16x128xf32, #tpu.memory_space<vmem>>, vector<16x128xf32>
    tpu.vector_store %arg6[%c0_47, %c0_48], %117 {strides = array<i32>} : memref<16x128xf32, #tpu.memory_space<vmem>>, vector<16x128xf32>,
    return
  }
}

</mosaic_0001>

<bundles_post_ra>
// kernel: tpu_custom_call.1
= control target key start
LH: loop header
LB: loop body
LE: loop exit
PB: predicated region body
PF: predicated region fallthrough
CT: control target
= control target key end

     0   :  { %11 = vsyncpa [#allocation3], 0  ;;  %s4240_s0 = inlined_call_operand.hbm [shape: bf16[128,128], index: 0, kind: input, shape index: {}]   ;;  %s4241_s1 = inlined_call_operand.hbm [shape: f32[128,128], index: 1, kind: input, shape index: {}]   ;;  %s4242_s2 = inlined_call_operand.hbm [shape: bf16[3,128,128], index: 2, kind: input, shape index: {}]   ;;  %s4243_s3 = inlined_call_operand.vmem [shape: f32[3,1,128], index: 3, kind: input, shape index: {}]   ;;  %s4244_s4 = inlined_call_operand.hbm [shape: bf16[256,128], index: 4, kind: input, shape index: {}]   ;;  %s4245_s5 = inlined_call_operand.vmem [shape: f32[1,128], index: 5, kind: input, shape index: {}]   ;;  %s4246_s6 = inlined_call_operand.hbm [shape: f32[16,128], index: 6, kind: output, shape index: {}]  }
   0x1   :  { %12 = vsyncpa [#allocation6], 0 }
   0x2   :  { %13 = vsyncpa [#allocation9], 0 }
   0x3   :  { %14 = vsyncpa [#allocation4], 0  ;;  %s3464_s21 = smov [#allocation5]   ;;  %s3346_s25 = scalar_lea.hbm %s4241_s1, 2048 }
   0x4   :  { %s32_s22 = sshll.u32 %s3464_s21, 4  ;;  %p3347_p0 = scmp.ne.s32.totalorder %s4241_s1, %s3346_s25  ;;  %s33_s22 = int_to_ptr.vmem [resolvable:$true] %s32_s22 }
   0x5   :  { %p3350_p1 = scmp.lt.u32.totalorder %s3346_s25, %s4241_s1 }
   0x7   :  { %p3352_p2 = pnand %p3350_p1, %p3347_p0 }
   0x9   :  { %3355 = shalt.err (!%p3352_p2)
}
   0xa   :  { %s3356_s30 = scalar_lea.vmem %s33_s22, 2048  ;;  %p3361_p4 = scmp.lt.s32.totalorder %s33_s22, %s33_s22 }
   0xb   :  { %p3357_p3 = scmp.ne.s32.totalorder %s33_s22, %s3356_s30  ;;  %p3362_p5 = scmp.lt.s32.totalorder %s3356_s30, %s3356_s30 }
   0xd   :  { %p3363_p6 = por %p3362_p5, %p3361_p4 }
   0xf   :  { %p3364_p7 = pnand %p3363_p6, %p3357_p3 }
  0x11   :  { %3367 = shalt.err (!%p3364_p7)
}
  0x12   :  { %s3465_s7 = smov 128   ;;  %s3466_s8 = smov 8  }
  0x13   :  { %38 = dma.hbm_to_vmem [thread:$0]  %s4241_s1, 2048, %s33_s22, [#allocation6], %s3465_s7, %s3465_s7, %s3466_s8  }
  0x14   :  { %s3467_s11 = smov [#allocation2]   ;;  %s3368_s15 = scalar_lea.hbm %s4240_s0, 1024 }
  0x15   :  { %s20_s12 = sshll.u32 %s3467_s11, 4  ;;  %p3369_p8 = scmp.ne.s32.totalorder %s4240_s0, %s3368_s15  ;;  %s21_s12 = int_to_ptr.vmem [resolvable:$true] %s20_s12 }
  0x16   :  { %p3372_p9 = scmp.lt.u32.totalorder %s3368_s15, %s4240_s0 }
  0x18   :  { %p3374_p10 = pnand %p3372_p9, %p3369_p8 }
  0x1a   :  { %3377 = shalt.err (!%p3374_p10)
}
  0x1b   :  { %s3378_s20 = scalar_lea.vmem %s21_s12, 1024  ;;  %p3383_p12 = scmp.lt.s32.totalorder %s21_s12, %s21_s12 }
  0x1c   :  { %p3379_p11 = scmp.ne.s32.totalorder %s21_s12, %s3378_s20  ;;  %p3384_p13 = scmp.lt.s32.totalorder %s3378_s20, %s3378_s20 }
  0x1e   :  { %p3385_p0 = por %p3384_p13, %p3383_p12 }
  0x20   :  { %p3386_p1 = pnand %p3385_p0, %p3379_p11 }
  0x22   :  { %3389 = shalt.err (!%p3386_p1)
}
  0x23   :  { %s3468_s1 = smov 64   ;;  %s3469_s21 = smov 4  }
  0x24   :  { %26 = dma.hbm_to_vmem [thread:$0]  %s4240_s0, 1024, %s21_s12, [#allocation3], %s3468_s1, %s3468_s1, %s3469_s21  }
  0x25   :  { %s3470_s24 = smov [#allocation7]   ;;  %s3471_s26 = smov [#allocation8]  }
  0x26   :  { %s44_s25 = sshll.u32 %s3470_s24, 4  ;;  %s58_s27 = sshll.u32 %s3471_s26, 4  ;;  %s45_s25 = int_to_ptr.vmem [resolvable:$true] %s44_s25  ;;  %s3539_s27 = int_to_ptr.vmem [resolvable:$true] %s58_s27 }
  0x27   :  { %s3390_s30 = scalar_lea.hbm %s4242_s2, 3072 }
  0x28   :  { %p3391_p2 = scmp.ne.s32.totalorder %s4242_s2, %s3390_s30  ;;  %p3394_p3 = scmp.lt.u32.totalorder %s3390_s30, %s4242_s2 }
  0x2a   :  { %p3396_p4 = pnand %p3394_p3, %p3391_p2 }
  0x2c   :  { %3399 = shalt.err (!%p3396_p4)
}
  0x2d   :  { %s3400_s0 = scalar_lea.vmem %s45_s25, 3072  ;;  %p3405_p6 = scmp.lt.s32.totalorder %s45_s25, %s45_s25 }
  0x2e   :  { %p3401_p5 = scmp.ne.s32.totalorder %s45_s25, %s3400_s0  ;;  %p3406_p7 = scmp.lt.s32.totalorder %s3400_s0, %s3400_s0 }
  0x30   :  { %p3407_p8 = por %p3406_p7, %p3405_p6 }
  0x32   :  { %p3408_p9 = pnand %p3407_p8, %p3401_p5 }
  0x34   :  { %3411 = shalt.err (!%p3408_p9)
}
  0x35   :  { %50 = dma.hbm_to_vmem [thread:$0]  %s4242_s2, 3072, %s45_s25, [#allocation6], %s3468_s1, %s3468_s1, %s3469_s21  }
  0x36   :  { %s3412_s17 = scalar_lea.hbm %s4244_s4, 2048 }
  0x37   :  { %p3413_p10 = scmp.ne.s32.totalorder %s4244_s4, %s3412_s17  ;;  %p3416_p11 = scmp.lt.u32.totalorder %s3412_s17, %s4244_s4 }
  0x39   :  { %p3418_p12 = pnand %p3416_p11, %p3413_p10 }
  0x3b   :  { %3421 = shalt.err (!%p3418_p12)
}
  0x3c   :  { %s3422_s23 = scalar_lea.vmem %s3539_s27, 2048  ;;  %p3427_p0 = scmp.lt.s32.totalorder %s3539_s27, %s3539_s27 }
  0x3d   :  { %p3423_p13 = scmp.ne.s32.totalorder %s3539_s27, %s3422_s23  ;;  %p3428_p1 = scmp.lt.s32.totalorder %s3422_s23, %s3422_s23 }
  0x3f   :  { %p3429_p2 = por %p3428_p1, %p3427_p0 }
  0x41   :  { %p3430_p3 = pnand %p3429_p2, %p3423_p13 }
  0x43   :  { %3433 = shalt.err (!%p3430_p3)
}
  0x44   :  { %64 = dma.hbm_to_vmem [thread:$0]  %s4244_s4, 2048, %s3539_s27, [#allocation9], %s3468_s1, %s3468_s1, %s3469_s21  }
  0x45   :  { %3456 = dma.done.wait [#allocation3], 1024  }
  0x46   :  { %3457 = vsyncadd [#allocation3], 4294966272 }
  0x47   :  { %3458 = dma.done.wait [#allocation6], 5120  }
  0x48   :  { %3459 = vsyncadd [#allocation6], 4294962176 }
  0x49   :  { %3460 = dma.done.wait [#allocation9], 2048  }
  0x4a   :  { %3461 = vsyncadd [#allocation9], 4294965248  ;;  %v3090_v0 = vld [vmem:[#allocation7] sm:$0xff]   ;;  %v3091_v1 = vld [vmem:[#allocation7 + $0x8] sm:$0xff]   ;;  %v3472_v16 = vmov 65   ;;  %s3473_s29 = smov [#allocation10]  }
  0x4b   :  { %2886 = vmatprep.subr.bf16.mxu0 %v3090_v0  ;;  %v3092_v2 = vld [vmem:[#allocation7 + $0x10] sm:$0xff]   ;;  %v3093_v3 = vld [vmem:[#allocation7 + $0x18] sm:$0xff]   ;;  %v3098_v4 = vld [vmem:[#allocation2] sm:$0xff]   ;;  %3089 = vset.pattern.permute.xlu1 %v3472_v16  ;;  %s2700_s30 = sshll.u32 %s3473_s29, 4  ;;  %s2701_s30 = int_to_ptr.vmem [resolvable:$true] %s2700_s30 }
  0x4c   :  { %2887 = vmatpush3.bf16.msra.mxu0 %v3090_v0  ;;  %2902 = vmatprep.mubr.bf16.mxu0 %v3098_v4  ;;  %v3094_v5 = vld [vmem:[#allocation7 + $0x20] sm:$0xff]   ;;  %v3095_v6 = vld [vmem:[#allocation7 + $0x28] sm:$0xff]   ;;  %v3096_v7 = vld [vmem:[#allocation7 + $0x30] sm:$0xff]   ;;  %s3434_s9 = scalar_lea.vmem %s2701_s30, 256  ;;  %p3439_p5 = scmp.lt.s32.totalorder %s2701_s30, %s2701_s30 }
  0x4d   :  { %2888 = vmatprep.subr.bf16.mxu0 %v3091_v1  ;;  %v3097_v8 = vld [vmem:[#allocation7 + $0x38] sm:$0xff]   ;;  %v3099_v9 = vld [vmem:[#allocation2 + $0x8] sm:$0xff]   ;;  %v3100_v10 = vld [vmem:[#allocation2 + $0x10] sm:$0xff]   ;;  %3088 = vset.pattern.permute.xlu0 %v3472_v16  ;;  %p3435_p4 = scmp.ne.s32.totalorder %s2701_s30, %s3434_s9  ;;  %p3440_p6 = scmp.lt.s32.totalorder %s3434_s9, %s3434_s9 }
  0x4e   :  { %v3101_v11 = vld [vmem:[#allocation2 + $0x18] sm:$0xff]   ;;  %v3102_v12 = vld [vmem:[#allocation2 + $0x20] sm:$0xff]   ;;  %v3103_v13 = vld [vmem:[#allocation2 + $0x28] sm:$0xff]  }
  0x4f   :  { %v3104_v14 = vld [vmem:[#allocation2 + $0x30] sm:$0xff]   ;;  %v3105_v15 = vld [vmem:[#allocation2 + $0x38] sm:$0xff]   ;;  %v3613_v16 = vld [vmem:[#allocation5 + $0x8] sm:$0xff]  ;;  %p3441_p7 = por %p3440_p6, %p3439_p5 }
  0x50   :  { %2889 = vmatpush3.bf16.msra.mxu0 %v3091_v1  ;;  %v481_v1 = vlaneseq }
  0x51   :  { %2890 = vmatprep.subr.bf16.mxu0 %v3092_v2  ;;  %p3442_p8 = pnand %p3441_p7, %p3435_p4 }
  0x54   :  { %2891 = vmatpush3.bf16.msra.mxu0 %v3092_v2  ;;  %v482_v2 = vshrl.u32 %v481_v1, 7 }
  0x55   :  { %2892 = vmatprep.subr.bf16.mxu0 %v3093_v3 }
  0x58   :  { %2893 = vmatpush3.bf16.msra.mxu0 %v3093_v3  ;;  %v3600_v3 = vsub.s32 0, %v482_v2 }
  0x59   :  { %2894 = vmatprep.subr.bf16.mxu0 %v3094_v5 }
  0x5c   :  { %2895 = vmatpush3.bf16.msra.mxu0 %v3094_v5 }
  0x5d   :  { %2896 = vmatprep.subr.bf16.mxu0 %v3095_v6 }
  0x60   :  { %2897 = vmatpush3.bf16.msra.mxu0 %v3095_v6 }
  0x61   :  { %2898 = vmatprep.subr.bf16.mxu0 %v3096_v7 }
  0x64   :  { %2899 = vmatpush3.bf16.msra.mxu0 %v3096_v7 }
  0x65   :  { %2900 = vmatprep.subr.bf16.mxu0 %v3097_v8 }
  0x68   :  { %2901 = vmatpush3.bf16.msra.mxu0 %v3097_v8 }
  0x6b   :  { %2903 = vmatmul.mubr.bf16.vlgmr.msra.gmra.mrb[0].mxu0 %v3099_v9  ;;  %v3607_v9 = vld [vmem:[#allocation5] sm:$0xff] }
  0x6c   :  { %2906 = vmatprep.mubr.bf16.mxu0 %v3100_v10 }
  0x73   :  { %2907 = vmatmul.mubr.bf16.gmra.mrb[4].mxu0 %v3101_v11 }
  0x74   :  { %2910 = vmatprep.mubr.bf16.mxu0 %v3102_v12 }
  0x7b   :  { %2911 = vmatmul.mubr.bf16.gmra.mrb[8].mxu0 %v3103_v13 }
  0x7c   :  { %2914 = vmatprep.mubr.bf16.mxu0 %v3104_v14 }
  0x83   :  { %2915 = vmatmul.mubr.bf16.gmra.mrb[12].mxu0 %v3105_v15 }
 0x13e   :  { %v2904_v17 = vpop.f32.mrb[0].mxu0 }
 0x13f   :  { %341 = vrot.lane.b32.xlu1 %v2904_v17, %s3468_s1  ;;  %v258_v18 = vpop.f32.mrb[1].mxu0 }
 0x140   :  { %337 = vrot.lane.b32.xlu0 %v258_v18, %s3468_s1  ;;  %v2905_v19 = vpop.f32.mrb[2].mxu0 }
 0x141   :  { %v718_v20 = vpack.c.bf16 %v2905_v19, %v2904_v17  ;;  %v261_v21 = vpop.f32.mrb[3].mxu0 }
 0x142   :  { %v717_v22 = vpack.c.bf16 %v261_v21, %v258_v18 }
 0x143   :  { %343 = vrot.lane.b32.xlu1 %v2905_v19, %s3468_s1 }
 0x144   :  { %339 = vrot.lane.b32.xlu0 %v261_v21, %s3468_s1  ;;  %2918 = vmatprep.subr.bf16.mxu1 %v717_v22 }
 0x145   :  { %2919 = vmatpush3.bf16.msra.mxu1 %v717_v22 }
 0x146   :  { %v2908_v23 = vpop.f32.mrb[4].mxu0  ;;  %2920 = vmatprep.subr.bf16.mxu1 %v718_v20 }
 0x147   :  { %v274_v24 = vpop.f32.mrb[5].mxu0 }
 0x148   :  { %345 = vrot.lane.b32.xlu0 %v274_v24, %s3468_s1  ;;  %v2909_v25 = vpop.f32.mrb[6].mxu0 }
 0x149   :  { %v720_v26 = vpack.c.bf16 %v2909_v25, %v2908_v23  ;;  %2921 = vmatpush3.bf16.msra.mxu1 %v718_v20  ;;  %351 = vrot.lane.b32.xlu1 %v2909_v25, %s3468_s1  ;;  %v277_v27 = vpop.f32.mrb[7].mxu0 }
 0x14a   :  { %v719_v28 = vpack.c.bf16 %v277_v27, %v274_v24 }
 0x14c   :  { %349 = vrot.lane.b32.xlu0 %v2908_v23, %s3468_s1  ;;  %2922 = vmatprep.subr.bf16.mxu1 %v719_v28 }
 0x14d   :  { %347 = vrot.lane.b32.xlu1 %v277_v27, %s3468_s1  ;;  %2923 = vmatpush3.bf16.msra.mxu1 %v719_v28 }
 0x14e   :  { %v2912_v29 = vpop.f32.mrb[8].mxu0  ;;  %2924 = vmatprep.subr.bf16.mxu1 %v720_v26 }
 0x14f   :  { %v290_v30 = vpop.f32.mrb[9].mxu0 }
 0x150   :  { %353 = vrot.lane.b32.xlu0 %v290_v30, %s3468_s1  ;;  %v2913_v31 = vpop.f32.mrb[10].mxu0 }
 0x151   :  { %v722_v32 = vpack.c.bf16 %v2913_v31, %v2912_v29  ;;  %2925 = vmatpush3.bf16.msra.mxu1 %v720_v26  ;;  %359 = vrot.lane.b32.xlu1 %v2913_v31, %s3468_s1  ;;  %v293_v33 = vpop.f32.mrb[11].mxu0 }
 0x152   :  { %v721_v34 = vpack.c.bf16 %v293_v33, %v290_v30 }
 0x154   :  { %357 = vrot.lane.b32.xlu0 %v2912_v29, %s3468_s1  ;;  %2926 = vmatprep.subr.bf16.mxu1 %v721_v34 }
 0x155   :  { %355 = vrot.lane.b32.xlu1 %v293_v33, %s3468_s1  ;;  %2927 = vmatpush3.bf16.msra.mxu1 %v721_v34 }
 0x156   :  { %v2916_v35 = vpop.f32.mrb[12].mxu0  ;;  %2928 = vmatprep.subr.bf16.mxu1 %v722_v32 }
 0x157   :  { %v306_v36 = vpop.f32.mrb[13].mxu0 }
 0x158   :  { %361 = vrot.lane.b32.xlu0 %v306_v36, %s3468_s1  ;;  %v2917_v37 = vpop.f32.mrb[14].mxu0 }
 0x159   :  { %422 = vperm.xlu1 %3089, %v261_v21   ;;  %2929 = vmatpush3.bf16.msra.mxu1 %v722_v32  ;;  %v724_v38 = vpack.c.bf16 %v2917_v37, %v2916_v35  ;;  %v309_v39 = vpop.f32.mrb[15].mxu0  ;;  %v3620_v21 = vld [vmem:[#allocation5 + $0x10] sm:$0xff]  ;;  %v3634_v32 = vld [vmem:[#allocation5 + $0x20] sm:$0xff] }
 0x15a   :  { %v723_v40 = vpack.c.bf16 %v309_v39, %v306_v36 }
 0x15c   :  { %365 = vrot.lane.b32.xlu0 %v2916_v35, %s3468_s1  ;;  %2930 = vmatprep.subr.bf16.mxu1 %v723_v40 }
 0x15d   :  { %426 = vperm.xlu1 %3089, %v2904_v17   ;;  %2931 = vmatpush3.bf16.msra.mxu1 %v723_v40 }
 0x15e   :  { %2932 = vmatprep.subr.bf16.mxu1 %v724_v38 }
 0x160   :  { %418 = vperm.xlu0 %3088, %v258_v18  }
 0x161   :  { %434 = vperm.xlu1 %3089, %v274_v24   ;;  %2933 = vmatpush3.bf16.msra.mxu1 %v724_v38  ;;  %v3641_v38 = vld [vmem:[#allocation5 + $0x28] sm:$0xff] }
 0x164   :  { %430 = vperm.xlu0 %3088, %v2905_v19  }
 0x165   :  { %442 = vperm.xlu1 %3089, %v2908_v23  }
 0x168   :  { %438 = vperm.xlu0 %3088, %v277_v27   ;;  %v3627_v27 = vld [vmem:[#allocation5 + $0x18] sm:$0xff] }
 0x169   :  { %450 = vperm.xlu1 %3089, %v290_v30  }
 0x16c   :  { %446 = vperm.xlu0 %3088, %v2909_v25  }
 0x16d   :  { %458 = vperm.xlu1 %3089, %v2912_v29  }
 0x170   :  { %454 = vperm.xlu0 %3088, %v293_v33  }
 0x171   :  { %474 = vperm.xlu1 %3089, %v2916_v35  }
 0x174   :  { %462 = vperm.xlu0 %3088, %v2913_v31  }
 0x175   :  { %466 = vperm.xlu1 %3089, %v306_v36  }
 0x178   :  { %478 = vperm.xlu0 %3088, %v2917_v37  }
 0x179   :  { %367 = vrot.lane.b32.xlu1 %v2917_v37, %s3468_s1 }
 0x17c   :  { %470 = vperm.xlu0 %3088, %v309_v39  }
 0x17d   :  { %363 = vrot.lane.b32.xlu1 %v309_v39, %s3468_s1 }
 0x1b1   :  { %v342_v42 = vpop.permute.xlu1 %341 }
 0x1b2   :  { %v338_v41 = vpop.permute.xlu0 %337 }
 0x1b3   :  { %385 = vxpose.xlu1.b32.start [1/16] (narrow) %v338_v41, 8 }
 0x1b5   :  { %v344_v44 = vpop.permute.xlu1 %343 }
 0x1b6   :  { %v340_v43 = vpop.permute.xlu0 %339 }
 0x1b7   :  { %386 = vxpose.xlu1.b32.cont [2/16] (narrow) %v340_v43, 8  ;;  %v3648_v43 = vld [vmem:[#allocation5 + $0x30] sm:$0xff] }
 0x1ba   :  { %v346_v46 = vpop.permute.xlu0 %345 }
 0x1bb   :  { %387 = vxpose.xlu1.b32.cont [3/16] (narrow) %v342_v42, 8  ;;  %v352_v45 = vpop.permute.xlu1 %351 }
 0x1be   :  { %v350_v48 = vpop.permute.xlu0 %349 }
 0x1bf   :  { %388 = vxpose.xlu1.b32.cont [4/16] (narrow) %v344_v44, 8  ;;  %v348_v47 = vpop.permute.xlu1 %347 }
 0x1c2   :  { %v354_v50 = vpop.permute.xlu0 %353 }
 0x1c3   :  { %389 = vxpose.xlu1.b32.cont [5/16] (narrow) %v346_v46, 8  ;;  %v360_v49 = vpop.permute.xlu1 %359 }
 0x1c6   :  { %v358_v53 = vpop.permute.xlu0 %357 }
 0x1c7   :  { %390 = vxpose.xlu1.b32.cont [6/16] (narrow) %v348_v47, 8  ;;  %v356_v51 = vpop.permute.xlu1 %355 }
 0x1ca   :  { %v362_v56 = vpop.permute.xlu0 %361 }
 0x1cb   :  { %391 = vxpose.xlu1.b32.cont [7/16] (narrow) %v350_v48, 8 }
 0x1ce   :  { %v366_v0 = vpop.permute.xlu0 %365 }
 0x1cf   :  { %392 = vxpose.xlu1.b32.cont [8/16] (narrow) %v352_v45, 8 }
 0x1d3   :  { %393 = vxpose.xlu1.b32.cont [9/16] (narrow) %v354_v50, 8 }
 0x1d7   :  { %394 = vxpose.xlu1.b32.cont [10/16] (narrow) %v356_v51, 8 }
 0x1d8   :  { %v423_v52 = vpop.permute.xlu1 %422 }
 0x1db   :  { %395 = vxpose.xlu1.b32.cont [11/16] (narrow) %v358_v53, 8 }
 0x1dc   :  { %v427_v54 = vpop.permute.xlu1 %426 }
 0x1df   :  { %396 = vxpose.xlu1.b32.cont [12/16] (narrow) %v360_v49, 8  ;;  %v419_v6 = vpop.permute.xlu0 %418  ;;  %v3656_v49 = vld [vmem:[#allocation5 + $0x38] sm:$0xff] }
 0x1e0   :  { %v435_v55 = vpop.permute.xlu1 %434 }
 0x1e3   :  { %397 = vxpose.xlu1.b32.cont [13/16] (narrow) %v362_v56, 8  ;;  %v431_v14 = vpop.permute.xlu0 %430 }
 0x1e4   :  { %v443_v57 = vpop.permute.xlu1 %442 }
 0x1e7   :  { %v439_v25 = vpop.permute.xlu0 %438 }
 0x1e8   :  { %v3592_v58 = vpop.permute.xlu1 %450 }
 0x1eb   :  { %v447_v36 = vpop.permute.xlu0 %446 }
 0x1ec   :  { %v3594_v59 = vpop.permute.xlu1 %458 }
 0x1ef   :  { %v455_v47 = vpop.permute.xlu0 %454 }
 0x1f0   :  { %v3596_v60 = vpop.permute.xlu1 %474 }
 0x1f3   :  { %v463_v53 = vpop.permute.xlu0 %462 }
 0x1f4   :  { %v3598_v61 = vpop.permute.xlu1 %466 }
 0x1f8   :  { %v368_v62 = vpop.permute.xlu1 %367 }
 0x1fc   :  { %v364_v63 = vpop.permute.xlu1 %363 }
 0x1fd   :  { %398 = vxpose.xlu1.b32.cont [14/16] (narrow) %v364_v63, 8  ;;  %v3671_v63 = vld [vmem:[#allocation5 + $0x48] sm:$0xff] }
 0x201   :  { %399 = vxpose.xlu1.b32.cont [15/16] (narrow) %v366_v0, 8 }
 0x205   :  { %400 = vxpose.xlu1.b32.end [16/16] (narrow) %v368_v62, 8 }
 0x249   :  { %v401_v4 = vpop.trf.xlu1 }
 0x24a   :  { %v3603_v5 = vrot.slane %v401_v4, %v3600_v3  ;;  %v479_v4 = vpop.permute.xlu0 %478 }
 0x24c   :  { %v485_v7 = vadd.f32 %v3603_v5, %v419_v6  ;;  %v486_v8 = vadd.f32 %v3603_v5, %v423_v52  ;;  %v487_v12 = vadd.f32 %v3603_v5, %v427_v54  ;;  %v488_v19 = vadd.f32 %v3603_v5, %v431_v14 }
 0x24d   :  { %v489_v24 = vadd.f32 %v3603_v5, %v435_v55  ;;  %v490_v30 = vadd.f32 %v3603_v5, %v439_v25  ;;  %v491_v35 = vadd.f32 %v3603_v5, %v443_v57  ;;  %v492_v41 = vadd.f32 %v3603_v5, %v447_v36  ;;  %v3663_v55 = vld [vmem:[#allocation5 + $0x40] sm:$0xff] }
 0x24e   :  { %vm501_vm0 = vcmp.gt.f32.partialorder %v485_v7, 0.0  ;;  %v517_v10 = vmul.f32 0.2, %v485_v7  ;;  %v518_v11 = vmul.f32 0.2, %v486_v8  ;;  %vm502_vm1 = vcmp.gt.f32.partialorder %v486_v8, 0.0 }
 0x24f   :  { %v519_v18 = vmul.f32 0.2, %v487_v12  ;;  %vm503_vm2 = vcmp.gt.f32.partialorder %v487_v12, 0.0  ;;  %v520_v23 = vmul.f32 0.2, %v488_v19  ;;  %vm504_vm3 = vcmp.gt.f32.partialorder %v488_v19, 0.0 }
 0x250   :  { %v533_v13 = vsel %vm501_vm0, %v485_v7, %v517_v10  ;;  %v534_v17 = vsel %vm502_vm1, %v486_v8, %v518_v11  ;;  %v521_v29 = vmul.f32 0.2, %v489_v24  ;;  %vm505_vm4 = vcmp.gt.f32.partialorder %v489_v24, 0.0  ;;  %v471_v11 = vpop.permute.xlu0 %470 }
 0x251   :  { %v3611_v15 = vadd.f32 %v533_v13, %v3607_v9  ;;  %v3618_v20 = vadd.f32 %v534_v17, %v3613_v16  ;;  %v535_v22 = vsel %vm503_vm2, %v487_v12, %v519_v18  ;;  %v536_v28 = vsel %vm504_vm3, %v488_v19, %v520_v23  ;;  %v3686_v13 = vld [vmem:[#allocation5 + $0x58] sm:$0xff] }
 0x252   :  { %v3625_v26 = vadd.f32 %v535_v22, %v3620_v21  ;;  %v3632_v31 = vadd.f32 %v536_v28, %v3627_v27  ;;  %v537_v33 = vsel %vm505_vm4, %v489_v24, %v521_v29  ;;  %v522_v34 = vmul.f32 0.2, %v490_v30  ;;  %v3701_v28 = vld [vmem:[#allocation5 + $0x68] sm:$0xff] }
 0x253   :  { %565 = vmax.xlane.f32.xlu0 %v3611_v15  ;;  %vm506_vm5 = vcmp.gt.f32.partialorder %v490_v30, 0.0  ;;  %v3639_v37 = vadd.f32 %v537_v33, %v3634_v32  ;;  %v523_v40 = vmul.f32 0.2, %v491_v35  ;;  %vm507_vm6 = vcmp.gt.f32.partialorder %v491_v35, 0.0 }
 0x254   :  { %v538_v39 = vsel %vm506_vm5, %v490_v30, %v522_v34  ;;  %v524_v45 = vmul.f32 0.2, %v492_v41  ;;  %v493_v46 = vadd.f32 %v3603_v5, %v3592_v58  ;;  %vm508_vm7 = vcmp.gt.f32.partialorder %v492_v41, 0.0 }
 0x255   :  { %v3646_v42 = vadd.f32 %v538_v39, %v3641_v38  ;;  %v539_v44 = vsel %vm507_vm6, %v491_v35, %v523_v40  ;;  %v494_v52 = vadd.f32 %v3603_v5, %v455_v47  ;;  %v495_v58 = vadd.f32 %v3603_v5, %v3594_v59  ;;  %v3678_v59 = vld [vmem:[#allocation5 + $0x50] sm:$0xff]  ;;  %v3714_v40 = vld [vmem:[#allocation5 + $0x78] sm:$0xff] }
 0x256   :  { %v3654_v48 = vadd.f32 %v539_v44, %v3648_v43  ;;  %v540_v50 = vsel %vm508_vm7, %v492_v41, %v524_v45  ;;  %v525_v51 = vmul.f32 0.2, %v493_v46  ;;  %vm509_vm8 = vcmp.gt.f32.partialorder %v493_v46, 0.0  ;;  %v3708_v35 = vld [vmem:[#allocation5 + $0x70] sm:$0xff] }
 0x257   :  { %567 = vmax.xlane.f32.xlu0 %v3618_v20  ;;  %v3661_v54 = vadd.f32 %v540_v50, %v3656_v49  ;;  %v526_v57 = vmul.f32 0.2, %v494_v52  ;;  %vm510_vm9 = vcmp.gt.f32.partialorder %v494_v52, 0.0  ;;  %v527_v1 = vmul.f32 0.2, %v495_v58 }
 0x258   :  { %v541_v56 = vsel %vm509_vm8, %v493_v46, %v525_v51  ;;  %v496_v2 = vadd.f32 %v3603_v5, %v463_v53  ;;  %vm511_vm10 = vcmp.gt.f32.partialorder %v495_v58, 0.0  ;;  %v497_v10 = vadd.f32 %v3603_v5, %v3598_v61  ;;  %v3693_v61 = vld [vmem:[#allocation5 + $0x60] sm:$0xff] }
 0x259   :  { %v3669_v62 = vadd.f32 %v541_v56, %v3663_v55  ;;  %v542_v0 = vsel %vm510_vm9, %v494_v52, %v526_v57  ;;  %v543_v7 = vsel %vm511_vm10, %v495_v58, %v527_v1  ;;  %v498_v18 = vadd.f32 %v3603_v5, %v471_v11 }
 0x25a   :  { %v3676_v6 = vadd.f32 %v542_v0, %v3671_v63  ;;  %v528_v8 = vmul.f32 0.2, %v496_v2  ;;  %vm512_vm11 = vcmp.gt.f32.partialorder %v496_v2, 0.0  ;;  %v3684_v12 = vadd.f32 %v543_v7, %v3678_v59 }
 0x25b   :  { %569 = vmax.xlane.f32.xlu0 %v3625_v26  ;;  %v529_v17 = vmul.f32 0.2, %v497_v10  ;;  %vm513_vm12 = vcmp.gt.f32.partialorder %v497_v10, 0.0  ;;  %v530_v23 = vmul.f32 0.2, %v498_v18  ;;  %v499_v24 = vadd.f32 %v3603_v5, %v3596_v60 }
 0x25c   :  { %v544_v14 = vsel %vm512_vm11, %v496_v2, %v528_v8  ;;  %vm514_vm13 = vcmp.gt.f32.partialorder %v498_v18, 0.0  ;;  %v500_v33 = vadd.f32 %v3603_v5, %v479_v4 }
 0x25d   :  { %v3691_v19 = vadd.f32 %v544_v14, %v3686_v13  ;;  %v545_v22 = vsel %vm513_vm12, %v497_v10, %v529_v17  ;;  %v546_v29 = vsel %vm514_vm13, %v498_v18, %v530_v23  ;;  %v531_v30 = vmul.f32 0.2, %v499_v24 }
 0x25e   :  { %v3699_v25 = vadd.f32 %v545_v22, %v3693_v61  ;;  %vm515_vm14 = vcmp.gt.f32.partialorder %v499_v24, 0.0  ;;  %v3706_v34 = vadd.f32 %v546_v29, %v3701_v28  ;;  %v532_v36 = vmul.f32 0.2, %v500_v33 }
 0x25f   :  { %571 = vmax.xlane.f32.xlu0 %v3632_v31  ;;  %v547_v60 = vsel %vm515_vm14, %v499_v24, %v531_v30  ;;  %vm516_vm15 = vcmp.gt.f32.partialorder %v500_v33, 0.0 }
 0x260   :  { %v3712_v39 = vadd.f32 %v547_v60, %v3708_v35  ;;  %v548_v41 = vsel %vm516_vm15, %v500_v33, %v532_v36 }
 0x261   :  { %v3718_v5 = vadd.f32 %v548_v41, %v3714_v40 }
 0x263   :  { %573 = vmax.xlane.f32.xlu0 %v3639_v37 }
 0x267   :  { %575 = vmax.xlane.f32.xlu0 %v3646_v42 }
 0x26b   :  { %577 = vmax.xlane.f32.xlu0 %v3654_v48 }
 0x26f   :  { %579 = vmax.xlane.f32.xlu0 %v3661_v54 }
 0x273   :  { %581 = vmax.xlane.f32.xlu0 %v3669_v62 }
 0x277   :  { %583 = vmax.xlane.f32.xlu0 %v3676_v6 }
 0x27b   :  { %585 = vmax.xlane.f32.xlu0 %v3684_v12 }
 0x27f   :  { %587 = vmax.xlane.f32.xlu0 %v3691_v19 }
 0x283   :  { %589 = vmax.xlane.f32.xlu0 %v3699_v25 }
 0x287   :  { %591 = vmax.xlane.f32.xlu0 %v3706_v34 }
 0x28b   :  { %593 = vmax.xlane.f32.xlu0 %v3712_v39 }
 0x28f   :  { %595 = vmax.xlane.f32.xlu0 %v3718_v5 }
 0x2e0   :  { %v566_v44 = vpop.xlane.xlu0 %565 }
 0x2e1   :  { %v597_v45 = vsub.f32 %v3611_v15, %v566_v44 }
 0x2e3   :  { %v613_v46 = vmul.f32 1.442695, %v597_v45 }
 0x2e4   :  { %v568_v47 = vpop.xlane.xlu0 %567 }
 0x2e5   :  { %3138 = vpow2.f32 %v613_v46  ;;  %v598_v50 = vsub.f32 %v3618_v20, %v568_v47 }
 0x2e7   :  { %v615_v51 = vmul.f32 1.442695, %v598_v50 }
 0x2e8   :  { %v570_v52 = vpop.xlane.xlu0 %569 }
 0x2e9   :  { %3140 = vpow2.f32 %v615_v51  ;;  %v599_v53 = vsub.f32 %v3625_v26, %v570_v52 }
 0x2eb   :  { %v617_v56 = vmul.f32 1.442695, %v599_v53 }
 0x2ec   :  { %v572_v57 = vpop.xlane.xlu0 %571 }
 0x2ed   :  { %3142 = vpow2.f32 %v617_v56  ;;  %v600_v58 = vsub.f32 %v3632_v31, %v572_v57 }
 0x2ef   :  { %v3725_v0 = vpop.eup %3138  ;;  %v619_v1 = vmul.f32 1.442695, %v600_v58 }
 0x2f0   :  { %645 = vadd.xlane.f32.xlu0 %v3725_v0  ;;  %v574_v15 = vpop.xlane.xlu0 %573 }
 0x2f1   :  { %3144 = vpow2.f32 %v619_v1  ;;  %v601_v2 = vsub.f32 %v3639_v37, %v574_v15 }
 0x2f3   :  { %v3729_v20 = vpop.eup %3140  ;;  %v621_v4 = vmul.f32 1.442695, %v601_v2 }
 0x2f4   :  { %647 = vadd.xlane.f32.xlu0 %v3729_v20  ;;  %v576_v26 = vpop.xlane.xlu0 %575 }
 0x2f5   :  { %3146 = vpow2.f32 %v621_v4  ;;  %v602_v7 = vsub.f32 %v3646_v42, %v576_v26 }
 0x2f7   :  { %v3733_v8 = vpop.eup %3142  ;;  %v623_v31 = vmul.f32 1.442695, %v602_v7 }
 0x2f8   :  { %649 = vadd.xlane.f32.xlu1 %v3733_v8  ;;  %v578_v10 = vpop.xlane.xlu0 %577 }
 0x2f9   :  { %3148 = vpow2.f32 %v623_v31  ;;  %v603_v11 = vsub.f32 %v3654_v48, %v578_v10  ;;  %v3106_v10 = vld [vmem:[#allocation7 + $0x40] sm:$0xff]  }
 0x2fa   :  { %2950 = vmatprep.subr.bf16.mxu0 %v3106_v10 }
 0x2fb   :  { %v3737_v14 = vpop.eup %3144  ;;  %v625_v37 = vmul.f32 1.442695, %v603_v11  ;;  %2951 = vmatpush3.bf16.msra.mxu0 %v3106_v10  ;;  %v3108_v11 = vld [vmem:[#allocation7 + $0x50] sm:$0xff]  }
 0x2fc   :  { %651 = vadd.xlane.f32.xlu0 %v3737_v14  ;;  %v580_v17 = vpop.xlane.xlu0 %579 }
 0x2fd   :  { %3150 = vpow2.f32 %v625_v37  ;;  %v604_v18 = vsub.f32 %v3661_v54, %v580_v17  ;;  %v3109_v37 = vld [vmem:[#allocation7 + $0x58] sm:$0xff]   ;;  %v3110_v17 = vld [vmem:[#allocation7 + $0x60] sm:$0xff]  }
 0x2ff   :  { %v3741_v22 = vpop.eup %3146  ;;  %v627_v42 = vmul.f32 1.442695, %v604_v18  ;;  %v3111_v18 = vld [vmem:[#allocation7 + $0x68] sm:$0xff]  }
 0x300   :  { %653 = vadd.xlane.f32.xlu0 %v3741_v22  ;;  %v582_v23 = vpop.xlane.xlu0 %581 }
 0x301   :  { %3152 = vpow2.f32 %v627_v42  ;;  %v605_v24 = vsub.f32 %v3669_v62, %v582_v23 }
 0x303   :  { %v3745_v29 = vpop.eup %3148  ;;  %v629_v48 = vmul.f32 1.442695, %v605_v24 }
 0x304   :  { %655 = vadd.xlane.f32.xlu0 %v3745_v29  ;;  %v584_v30 = vpop.xlane.xlu0 %583 }
 0x305   :  { %3154 = vpow2.f32 %v629_v48  ;;  %v606_v33 = vsub.f32 %v3676_v6, %v584_v30 }
 0x307   :  { %v3749_v60 = vpop.eup %3150  ;;  %v631_v54 = vmul.f32 1.442695, %v606_v33 }
 0x308   :  { %657 = vadd.xlane.f32.xlu0 %v3749_v60  ;;  %v586_v36 = vpop.xlane.xlu0 %585 }
 0x309   :  { %3156 = vpow2.f32 %v631_v54  ;;  %v607_v41 = vsub.f32 %v3684_v12, %v586_v36 }
 0x30b   :  { %v3753_v44 = vpop.eup %3152  ;;  %v633_v62 = vmul.f32 1.442695, %v607_v41 }
 0x30c   :  { %659 = vadd.xlane.f32.xlu0 %v3753_v44  ;;  %v588_v45 = vpop.xlane.xlu0 %587 }
 0x30d   :  { %3158 = vpow2.f32 %v633_v62  ;;  %v608_v46 = vsub.f32 %v3691_v19, %v588_v45 }
 0x30f   :  { %v3757_v47 = vpop.eup %3154  ;;  %v635_v6 = vmul.f32 1.442695, %v608_v46 }
 0x310   :  { %661 = vadd.xlane.f32.xlu0 %v3757_v47  ;;  %v590_v50 = vpop.xlane.xlu0 %589 }
 0x311   :  { %3160 = vpow2.f32 %v635_v6  ;;  %v609_v51 = vsub.f32 %v3699_v25, %v590_v50 }
 0x313   :  { %v3761_v52 = vpop.eup %3156  ;;  %v637_v12 = vmul.f32 1.442695, %v609_v51 }
 0x314   :  { %663 = vadd.xlane.f32.xlu0 %v3761_v52  ;;  %v592_v53 = vpop.xlane.xlu0 %591 }
 0x315   :  { %3162 = vpow2.f32 %v637_v12  ;;  %v610_v56 = vsub.f32 %v3706_v34, %v592_v53 }
 0x317   :  { %v3765_v57 = vpop.eup %3158  ;;  %v639_v19 = vmul.f32 1.442695, %v610_v56 }
 0x318   :  { %665 = vadd.xlane.f32.xlu0 %v3765_v57  ;;  %v594_v58 = vpop.xlane.xlu0 %593 }
 0x319   :  { %3164 = vpow2.f32 %v639_v19  ;;  %v611_v1 = vsub.f32 %v3712_v39, %v594_v58 }
 0x31b   :  { %v3769_v15 = vpop.eup %3160  ;;  %v641_v25 = vmul.f32 1.442695, %v611_v1 }
 0x31c   :  { %667 = vadd.xlane.f32.xlu0 %v3769_v15  ;;  %v596_v2 = vpop.xlane.xlu0 %595 }
 0x31d   :  { %3166 = vpow2.f32 %v641_v25  ;;  %v612_v4 = vsub.f32 %v3718_v5, %v596_v2  ;;  %v3107_v5 = vld [vmem:[#allocation7 + $0x48] sm:$0xff]  }
 0x31e   :  { %2952 = vmatprep.subr.bf16.mxu0 %v3107_v5 }
 0x31f   :  { %v3773_v26 = vpop.eup %3162  ;;  %v643_v34 = vmul.f32 1.442695, %v612_v4  ;;  %2953 = vmatpush3.bf16.msra.mxu0 %v3107_v5 }
 0x320   :  { %669 = vadd.xlane.f32.xlu0 %v3773_v26  ;;  %2954 = vmatprep.subr.bf16.mxu0 %v3108_v11 }
 0x321   :  { %3168 = vpow2.f32 %v643_v34 }
 0x323   :  { %v3776_v7 = vpop.eup %3164  ;;  %2955 = vmatpush3.bf16.msra.mxu0 %v3108_v11 }
 0x324   :  { %671 = vadd.xlane.f32.xlu1 %v3776_v7  ;;  %2956 = vmatprep.subr.bf16.mxu0 %v3109_v37 }
 0x327   :  { %v3779_v39 = vpop.eup %3166  ;;  %2957 = vmatpush3.bf16.msra.mxu0 %v3109_v37 }
 0x328   :  { %673 = vadd.xlane.f32.xlu0 %v3779_v39  ;;  %2958 = vmatprep.subr.bf16.mxu0 %v3110_v17 }
 0x32b   :  { %v3782_v31 = vpop.eup %3168  ;;  %2959 = vmatpush3.bf16.msra.mxu0 %v3110_v17 }
 0x32c   :  { %675 = vadd.xlane.f32.xlu1 %v3782_v31  ;;  %2960 = vmatprep.subr.bf16.mxu0 %v3111_v18 }
 0x32f   :  { %2961 = vmatpush3.bf16.msra.mxu0 %v3111_v18 }
 0x37d   :  { %v646_v42 = vpop.xlane.xlu0 %645 }
 0x37e   :  { %3170 = vrcp.f32 %v646_v42 }
 0x381   :  { %v648_v23 = vpop.xlane.xlu0 %647 }
 0x382   :  { %3172 = vrcp.f32 %v648_v23 }
 0x385   :  { %v650_v24 = vpop.xlane.xlu1 %649 }
 0x386   :  { %3174 = vrcp.f32 %v650_v24 }
 0x388   :  { %v3171_v30 = vpop.eup %3170 }
 0x389   :  { %v652_v48 = vpop.xlane.xlu0 %651  ;;  %v693_v36 = vmul.f32 %v3171_v30, %v3725_v0 }
 0x38a   :  { %3176 = vrcp.f32 %v652_v48 }
 0x38c   :  { %v3173_v33 = vpop.eup %3172 }
 0x38d   :  { %v654_v54 = vpop.xlane.xlu0 %653  ;;  %v694_v41 = vmul.f32 %v3173_v33, %v3729_v20 }
 0x38e   :  { %3178 = vrcp.f32 %v654_v54 }
 0x38f   :  { %v709_v62 = vpack.c.bf16 %v694_v41, %v693_v36 }
 0x390   :  { %v3175_v46 = vpop.eup %3174 }
 0x391   :  { %2934 = vmatprep.mubr.bf16.mxu1 %v709_v62  ;;  %v656_v45 = vpop.xlane.xlu0 %655  ;;  %v695_v51 = vmul.f32 %v3175_v46, %v3733_v8 }
 0x392   :  { %3180 = vrcp.f32 %v656_v45 }
 0x394   :  { %v3177_v6 = vpop.eup %3176 }
 0x395   :  { %v658_v50 = vpop.xlane.xlu0 %657  ;;  %v696_v12 = vmul.f32 %v3177_v6, %v3737_v14 }
 0x396   :  { %3182 = vrcp.f32 %v658_v50  ;;  %v3112_v50 = vld [vmem:[#allocation7 + $0x70] sm:$0xff]  }
 0x397   :  { %v710_v53 = vpack.c.bf16 %v696_v12, %v695_v51  ;;  %v3113_v51 = vld [vmem:[#allocation7 + $0x78] sm:$0xff]   ;;  %2962 = vmatprep.subr.bf16.mxu0 %v3112_v50 }
 0x398   :  { %v3179_v19 = vpop.eup %3178  ;;  %2963 = vmatpush3.bf16.msra.mxu0 %v3112_v50 }
 0x399   :  { %2935 = vmatmul.mubr.bf16.vlgmr.msra.gmra.mrb[0].mxu1 %v710_v53  ;;  %v660_v56 = vpop.xlane.xlu0 %659  ;;  %v697_v58 = vmul.f32 %v3179_v19, %v3741_v22  ;;  %2964 = vmatprep.subr.bf16.mxu0 %v3113_v51 }
 0x39a   :  { %3184 = vrcp.f32 %v660_v56 }
 0x39c   :  { %v3181_v0 = vpop.eup %3180  ;;  %2965 = vmatpush3.bf16.msra.mxu0 %v3113_v51 }
 0x39d   :  { %v662_v20 = vpop.xlane.xlu0 %661  ;;  %v698_v1 = vmul.f32 %v3181_v0, %v3745_v29 }
 0x39e   :  { %3186 = vrcp.f32 %v662_v20 }
 0x39f   :  { %v711_v25 = vpack.c.bf16 %v698_v1, %v697_v58 }
 0x3a0   :  { %v3183_v4 = vpop.eup %3182 }
 0x3a1   :  { %2938 = vmatprep.mubr.bf16.mxu1 %v711_v25  ;;  %v664_v2 = vpop.xlane.xlu0 %663  ;;  %v699_v34 = vmul.f32 %v3183_v4, %v3749_v60 }
 0x3a2   :  { %3188 = vrcp.f32 %v664_v2 }
 0x3a4   :  { %v3185_v8 = vpop.eup %3184 }
 0x3a5   :  { %v666_v14 = vpop.xlane.xlu0 %665  ;;  %v700_v10 = vmul.f32 %v3185_v8, %v3753_v44 }
 0x3a6   :  { %3190 = vrcp.f32 %v666_v14 }
 0x3a7   :  { %v712_v5 = vpack.c.bf16 %v700_v10, %v699_v34 }
 0x3a8   :  { %v3187_v37 = vpop.eup %3186 }
 0x3a9   :  { %2939 = vmatmul.mubr.bf16.gmra.mrb[4].mxu1 %v712_v5  ;;  %v668_v11 = vpop.xlane.xlu0 %667  ;;  %v701_v17 = vmul.f32 %v3187_v37, %v3757_v47 }
 0x3aa   :  { %3192 = vrcp.f32 %v668_v11 }
 0x3ac   :  { %v3189_v22 = vpop.eup %3188 }
 0x3ad   :  { %v670_v29 = vpop.xlane.xlu0 %669  ;;  %v702_v18 = vmul.f32 %v3189_v22, %v3761_v52 }
 0x3ae   :  { %3194 = vrcp.f32 %v670_v29 }
 0x3af   :  { %v713_v42 = vpack.c.bf16 %v702_v18, %v701_v17 }
 0x3b0   :  { %v3191_v24 = vpop.eup %3190 }
 0x3b1   :  { %v672_v23 = vpop.xlane.xlu1 %671  ;;  %2942 = vmatprep.mubr.bf16.mxu1 %v713_v42  ;;  %v703_v48 = vmul.f32 %v3191_v24, %v3765_v57 }
 0x3b2   :  { %3196 = vrcp.f32 %v672_v23 }
 0x3b4   :  { %v3193_v60 = vpop.eup %3192 }
 0x3b5   :  { %v674_v44 = vpop.xlane.xlu0 %673  ;;  %v704_v30 = vmul.f32 %v3193_v60, %v3769_v15 }
 0x3b6   :  { %3198 = vrcp.f32 %v674_v44 }
 0x3b7   :  { %v714_v33 = vpack.c.bf16 %v704_v30, %v703_v48 }
 0x3b8   :  { %v3195_v36 = vpop.eup %3194 }
 0x3b9   :  { %v676_v54 = vpop.xlane.xlu1 %675  ;;  %2943 = vmatmul.mubr.bf16.gmra.mrb[8].mxu1 %v714_v33  ;;  %v705_v52 = vmul.f32 %v3195_v36, %v3773_v26  ;;  %v2730_v26 = vld [vmem:[%s4243_s3] ss:$0 sm:$0xff] }
 0x3ba   :  { %3200 = vrcp.f32 %v676_v54 }
 0x3bc   :  { %v3197_v47 = vpop.eup %3196 }
 0x3bd   :  { %v706_v41 = vmul.f32 %v3197_v47, %v3776_v7 }
 0x3bf   :  { %v715_v62 = vpack.c.bf16 %v706_v41, %v705_v52 }
 0x3c0   :  { %v3199_v45 = vpop.eup %3198 }
 0x3c1   :  { %2946 = vmatprep.mubr.bf16.mxu1 %v715_v62  ;;  %v707_v6 = vmul.f32 %v3199_v45, %v3779_v39 }
 0x3c4   :  { %v3201_v46 = vpop.eup %3200 }
 0x3c5   :  { %v708_v57 = vmul.f32 %v3201_v46, %v3782_v31 }
 0x3c7   :  { %v716_v15 = vpack.c.bf16 %v708_v57, %v707_v6 }
 0x3c9   :  { %2947 = vmatmul.mubr.bf16.gmra.mrb[12].mxu1 %v716_v15 }
 0x46c   :  { %v2936_v7 = vpop.f32.mrb[0].mxu1 }
 0x46d   :  { %v775_v12 = vadd.f32 %v2936_v7, %v2730_v26  ;;  %v766_v53 = vpop.f32.mrb[1].mxu1 }
 0x46e   :  { %v767_v56 = vadd.f32 %v2730_v26, %v766_v53  ;;  %v2937_v19 = vpop.f32.mrb[2].mxu1 }
 0x46f   :  { %v778_v39 = vadd.f32 %v2937_v19, %v2730_v26  ;;  %v769_v0 = vpop.f32.mrb[3].mxu1  ;;  %v831_v20 = vmax.f32 %v775_v12, 0.0 }
 0x470   :  { %v770_v31 = vadd.f32 %v2730_v26, %v769_v0  ;;  %v829_v1 = vmax.f32 %v767_v56, 0.0 }
 0x471   :  { %v832_v58 = vmax.f32 %v778_v39, 0.0 }
 0x472   :  { %v830_v25 = vmax.f32 %v770_v31, 0.0 }
 0x473   :  { %v846_v2 = vpack.c.bf16 %v832_v58, %v831_v20 }
 0x474   :  { %v845_v4 = vpack.c.bf16 %v830_v25, %v829_v1 }
 0x476   :  { %2966 = vmatprep.mubr.bf16.mxu0 %v845_v4 }
 0x477   :  { %2967 = vmatmul.mubr.bf16.vlgmr.msra.gmra.mrb[16].mxu0 %v846_v2 }
 0x47c   :  { %v2940_v8 = vpop.f32.mrb[4].mxu1 }
 0x47d   :  { %v791_v14 = vadd.f32 %v2940_v8, %v2730_v26  ;;  %v782_v34 = vpop.f32.mrb[5].mxu1 }
 0x47e   :  { %v783_v10 = vadd.f32 %v2730_v26, %v782_v34  ;;  %v2941_v5 = vpop.f32.mrb[6].mxu1 }
 0x47f   :  { %v794_v11 = vadd.f32 %v2941_v5, %v2730_v26  ;;  %v785_v37 = vpop.f32.mrb[7].mxu1  ;;  %v835_v29 = vmax.f32 %v791_v14, 0.0 }
 0x480   :  { %v786_v22 = vadd.f32 %v2730_v26, %v785_v37  ;;  %v833_v18 = vmax.f32 %v783_v10, 0.0 }
 0x481   :  { %v836_v17 = vmax.f32 %v794_v11, 0.0 }
 0x482   :  { %v834_v42 = vmax.f32 %v786_v22, 0.0 }
 0x483   :  { %v848_v23 = vpack.c.bf16 %v836_v17, %v835_v29 }
 0x484   :  { %v847_v24 = vpack.c.bf16 %v834_v42, %v833_v18 }
 0x486   :  { %2970 = vmatprep.mubr.bf16.mxu0 %v847_v24 }
 0x487   :  { %2971 = vmatmul.mubr.bf16.gmra.mrb[20].mxu0 %v848_v23 }
 0x48c   :  { %v2944_v60 = vpop.f32.mrb[8].mxu1 }
 0x48d   :  { %v807_v44 = vadd.f32 %v2944_v60, %v2730_v26  ;;  %v798_v48 = vpop.f32.mrb[9].mxu1 }
 0x48e   :  { %v799_v30 = vadd.f32 %v2730_v26, %v798_v48  ;;  %v2945_v33 = vpop.f32.mrb[10].mxu1 }
 0x48f   :  { %v810_v54 = vadd.f32 %v2945_v33, %v2730_v26  ;;  %v801_v36 = vpop.f32.mrb[11].mxu1  ;;  %v839_v52 = vmax.f32 %v807_v44, 0.0 }
 0x490   :  { %v802_v47 = vadd.f32 %v2730_v26, %v801_v36  ;;  %v837_v62 = vmax.f32 %v799_v30, 0.0 }
 0x491   :  { %v840_v41 = vmax.f32 %v810_v54, 0.0 }
 0x492   :  { %v838_v45 = vmax.f32 %v802_v47, 0.0 }
 0x493   :  { %v850_v46 = vpack.c.bf16 %v840_v41, %v839_v52 }
 0x494   :  { %v849_v6 = vpack.c.bf16 %v838_v45, %v837_v62 }
 0x496   :  { %2974 = vmatprep.mubr.bf16.mxu0 %v849_v6 }
 0x497   :  { %2975 = vmatmul.mubr.bf16.gmra.mrb[24].mxu0 %v850_v46 }
 0x49c   :  { %v2948_v57 = vpop.f32.mrb[12].mxu1 }
 0x49d   :  { %v823_v15 = vadd.f32 %v2948_v57, %v2730_v26  ;;  %v814_v50 = vpop.f32.mrb[13].mxu1 }
 0x49e   :  { %v815_v51 = vadd.f32 %v2730_v26, %v814_v50  ;;  %v2949_v7 = vpop.f32.mrb[14].mxu1 }
 0x49f   :  { %v826_v12 = vadd.f32 %v2949_v7, %v2730_v26  ;;  %v817_v53 = vpop.f32.mrb[15].mxu1  ;;  %v843_v19 = vmax.f32 %v823_v15, 0.0 }
 0x4a0   :  { %v818_v56 = vadd.f32 %v2730_v26, %v817_v53  ;;  %v841_v0 = vmax.f32 %v815_v51, 0.0 }
 0x4a1   :  { %v844_v39 = vmax.f32 %v826_v12, 0.0 }
 0x4a2   :  { %v842_v31 = vmax.f32 %v818_v56, 0.0 }
 0x4a3   :  { %v852_v20 = vpack.c.bf16 %v844_v39, %v843_v19 }
 0x4a4   :  { %v851_v58 = vpack.c.bf16 %v842_v31, %v841_v0 }
 0x4a6   :  { %2978 = vmatprep.mubr.bf16.mxu0 %v851_v58 }
 0x4a7   :  { %2979 = vmatmul.mubr.bf16.gmra.mrb[28].mxu0 %v852_v20 }
 0x54a   :  { %v2968_v1 = vpop.f32.mrb[16].mxu0 }
 0x54b   :  { %1035 = vrot.lane.b32.xlu1 %v2968_v1, %s3468_s1  ;;  %v952_v25 = vpop.f32.mrb[17].mxu0 }
 0x54c   :  { %1031 = vrot.lane.b32.xlu0 %v952_v25, %s3468_s1  ;;  %v2969_v2 = vpop.f32.mrb[18].mxu0 }
 0x54d   :  { %v1412_v4 = vpack.c.bf16 %v2969_v2, %v2968_v1  ;;  %v955_v8 = vpop.f32.mrb[19].mxu0 }
 0x54e   :  { %v1411_v14 = vpack.c.bf16 %v955_v8, %v952_v25 }
 0x54f   :  { %1033 = vrot.lane.b32.xlu1 %v955_v8, %s3468_s1 }
 0x550   :  { %1037 = vrot.lane.b32.xlu0 %v2969_v2, %s3468_s1  ;;  %2982 = vmatprep.subr.bf16.mxu1 %v1411_v14 }
 0x551   :  { %2983 = vmatpush3.bf16.msra.mxu1 %v1411_v14 }
 0x552   :  { %2984 = vmatprep.subr.bf16.mxu1 %v1412_v4 }
 0x555   :  { %2985 = vmatpush3.bf16.msra.mxu1 %v1412_v4 }
 0x55a   :  { %v2972_v26 = vpop.f32.mrb[20].mxu0 }
 0x55b   :  { %1043 = vrot.lane.b32.xlu1 %v2972_v26, %s3468_s1  ;;  %v968_v34 = vpop.f32.mrb[21].mxu0 }
 0x55c   :  { %v2973_v10 = vpop.f32.mrb[22].mxu0 }
 0x55d   :  { %v1414_v5 = vpack.c.bf16 %v2973_v10, %v2972_v26  ;;  %v971_v11 = vpop.f32.mrb[23].mxu0 }
 0x55e   :  { %v1413_v37 = vpack.c.bf16 %v971_v11, %v968_v34  ;;  %1041 = vrot.lane.b32.xlu0 %v971_v11, %s3468_s1 }
 0x55f   :  { %1039 = vrot.lane.b32.xlu1 %v968_v34, %s3468_s1 }
 0x560   :  { %2986 = vmatprep.subr.bf16.mxu1 %v1413_v37 }
 0x561   :  { %2987 = vmatpush3.bf16.msra.mxu1 %v1413_v37 }
 0x562   :  { %1045 = vrot.lane.b32.xlu0 %v2973_v10, %s3468_s1  ;;  %2988 = vmatprep.subr.bf16.mxu1 %v1414_v5 }
 0x565   :  { %2989 = vmatpush3.bf16.msra.mxu1 %v1414_v5 }
 0x56a   :  { %v2976_v22 = vpop.f32.mrb[24].mxu0 }
 0x56b   :  { %1051 = vrot.lane.b32.xlu1 %v2976_v22, %s3468_s1  ;;  %v984_v29 = vpop.f32.mrb[25].mxu0 }
 0x56c   :  { %v2977_v17 = vpop.f32.mrb[26].mxu0 }
 0x56d   :  { %v1416_v18 = vpack.c.bf16 %v2977_v17, %v2976_v22  ;;  %v987_v42 = vpop.f32.mrb[27].mxu0 }
 0x56e   :  { %v1415_v23 = vpack.c.bf16 %v987_v42, %v984_v29  ;;  %1049 = vrot.lane.b32.xlu0 %v987_v42, %s3468_s1 }
 0x56f   :  { %1047 = vrot.lane.b32.xlu1 %v984_v29, %s3468_s1 }
 0x570   :  { %2990 = vmatprep.subr.bf16.mxu1 %v1415_v23 }
 0x571   :  { %2991 = vmatpush3.bf16.msra.mxu1 %v1415_v23 }
 0x572   :  { %1053 = vrot.lane.b32.xlu0 %v2977_v17, %s3468_s1  ;;  %2992 = vmatprep.subr.bf16.mxu1 %v1416_v18 }
 0x575   :  { %2993 = vmatpush3.bf16.msra.mxu1 %v1416_v18 }
 0x57a   :  { %v2980_v24 = vpop.f32.mrb[28].mxu0 }
 0x57b   :  { %1059 = vrot.lane.b32.xlu1 %v2980_v24, %s3468_s1  ;;  %v1000_v60 = vpop.f32.mrb[29].mxu0 }
 0x57c   :  { %v2981_v44 = vpop.f32.mrb[30].mxu0 }
 0x57d   :  { %v1418_v48 = vpack.c.bf16 %v2981_v44, %v2980_v24  ;;  %v1003_v30 = vpop.f32.mrb[31].mxu0 }
 0x57e   :  { %v1417_v33 = vpack.c.bf16 %v1003_v30, %v1000_v60  ;;  %1057 = vrot.lane.b32.xlu0 %v1003_v30, %s3468_s1 }
 0x57f   :  { %1055 = vrot.lane.b32.xlu1 %v1000_v60, %s3468_s1 }
 0x580   :  { %2994 = vmatprep.subr.bf16.mxu1 %v1417_v33 }
 0x581   :  { %2995 = vmatpush3.bf16.msra.mxu1 %v1417_v33 }
 0x582   :  { %1061 = vrot.lane.b32.xlu0 %v2981_v44, %s3468_s1  ;;  %2996 = vmatprep.subr.bf16.mxu1 %v1418_v48 }
 0x583   :  { %1112 = vperm.xlu1 %3089, %v952_v25  }
 0x585   :  { %2997 = vmatpush3.bf16.msra.mxu1 %v1418_v48 }
 0x586   :  { %1116 = vperm.xlu0 %3088, %v955_v8  }
 0x587   :  { %1120 = vperm.xlu1 %3089, %v2968_v1  }
 0x58a   :  { %1124 = vperm.xlu0 %3088, %v2969_v2  }
 0x58b   :  { %1128 = vperm.xlu1 %3089, %v968_v34  }
 0x58e   :  { %1132 = vperm.xlu0 %3088, %v971_v11  }
 0x58f   :  { %1136 = vperm.xlu1 %3089, %v2972_v26  }
 0x592   :  { %1140 = vperm.xlu0 %3088, %v2973_v10  }
 0x593   :  { %1144 = vperm.xlu1 %3089, %v984_v29  }
 0x596   :  { %1148 = vperm.xlu0 %3088, %v987_v42  }
 0x597   :  { %1152 = vperm.xlu1 %3089, %v2976_v22  }
 0x59a   :  { %1156 = vperm.xlu0 %3088, %v2977_v17  }
 0x59b   :  { %1160 = vperm.xlu1 %3089, %v1000_v60  }
 0x59e   :  { %1172 = vperm.xlu0 %3088, %v2981_v44  }
 0x59f   :  { %1168 = vperm.xlu1 %3089, %v2980_v24  }
 0x5a2   :  { %1164 = vperm.xlu0 %3088, %v1003_v30  }
 0x5bd   :  { %v1036_v54 = vpop.permute.xlu1 %1035 }
 0x5be   :  { %v1032_v36 = vpop.permute.xlu0 %1031 }
 0x5c1   :  { %v1034_v47 = vpop.permute.xlu1 %1033 }
 0x5c2   :  { %v1038_v41 = vpop.permute.xlu0 %1037 }
 0x5c8   :  { %1079 = vxpose.xlu1.b32.start [1/16] (narrow) %v1032_v36, 8 }
 0x5cc   :  { %1080 = vxpose.xlu1.b32.cont [2/16] (narrow) %v1034_v47, 8 }
 0x5cd   :  { %v1044_v52 = vpop.permute.xlu1 %1043 }
 0x5d0   :  { %1081 = vxpose.xlu1.b32.cont [3/16] (narrow) %v1036_v54, 8  ;;  %v1042_v45 = vpop.permute.xlu0 %1041 }
 0x5d1   :  { %v1040_v62 = vpop.permute.xlu1 %1039 }
 0x5d4   :  { %1082 = vxpose.xlu1.b32.cont [4/16] (narrow) %v1038_v41, 8  ;;  %v1046_v6 = vpop.permute.xlu0 %1045 }
 0x5d8   :  { %1083 = vxpose.xlu1.b32.cont [5/16] (narrow) %v1040_v62, 8 }
 0x5dc   :  { %1084 = vxpose.xlu1.b32.cont [6/16] (narrow) %v1042_v45, 8 }
 0x5dd   :  { %v1052_v46 = vpop.permute.xlu1 %1051 }
 0x5e0   :  { %1085 = vxpose.xlu1.b32.cont [7/16] (narrow) %v1044_v52, 8  ;;  %v1050_v15 = vpop.permute.xlu0 %1049 }
 0x5e1   :  { %v1048_v57 = vpop.permute.xlu1 %1047 }
 0x5e4   :  { %1086 = vxpose.xlu1.b32.cont [8/16] (narrow) %v1046_v6, 8  ;;  %v1054_v51 = vpop.permute.xlu0 %1053 }
 0x5e8   :  { %1087 = vxpose.xlu1.b32.cont [9/16] (narrow) %v1048_v57, 8 }
 0x5ec   :  { %1088 = vxpose.xlu1.b32.cont [10/16] (narrow) %v1050_v15, 8 }
 0x5ed   :  { %v1060_v50 = vpop.permute.xlu1 %1059 }
 0x5f0   :  { %1089 = vxpose.xlu1.b32.cont [11/16] (narrow) %v1052_v46, 8  ;;  %v1058_v12 = vpop.permute.xlu0 %1057 }
 0x5f1   :  { %v1056_v7 = vpop.permute.xlu1 %1055 }
 0x5f4   :  { %1090 = vxpose.xlu1.b32.cont [12/16] (narrow) %v1054_v51, 8  ;;  %v1062_v53 = vpop.permute.xlu0 %1061 }
 0x5f8   :  { %1091 = vxpose.xlu1.b32.cont [13/16] (narrow) %v1056_v7, 8 }
 0x5fc   :  { %1092 = vxpose.xlu1.b32.cont [14/16] (narrow) %v1058_v12, 8 }
 0x600   :  { %1093 = vxpose.xlu1.b32.cont [15/16] (narrow) %v1060_v50, 8 }
 0x602   :  { %v1113_v56 = vpop.permute.xlu1 %1112 }
 0x604   :  { %1094 = vxpose.xlu1.b32.end [16/16] (narrow) %v1062_v53, 8 }
 0x605   :  { %v1117_v4 = vpop.permute.xlu0 %1116 }
 0x606   :  { %v1121_v19 = vpop.permute.xlu1 %1120 }
 0x609   :  { %v1125_v11 = vpop.permute.xlu0 %1124 }
 0x60a   :  { %v1129_v39 = vpop.permute.xlu1 %1128 }
 0x60d   :  { %v1133_v60 = vpop.permute.xlu0 %1132 }
 0x60e   :  { %v1137_v0 = vpop.permute.xlu1 %1136 }
 0x611   :  { %v1141_v47 = vpop.permute.xlu0 %1140 }
 0x612   :  { %v1145_v31 = vpop.permute.xlu1 %1144 }
 0x615   :  { %v1149_v57 = vpop.permute.xlu0 %1148 }
 0x616   :  { %v3820_v20 = vpop.permute.xlu1 %1152 }
 0x61a   :  { %v3822_v58 = vpop.permute.xlu1 %1160 }
 0x61e   :  { %v3824_v1 = vpop.permute.xlu1 %1168 }
 0x648   :  { %v1095_v25 = vpop.trf.xlu1 }
 0x649   :  { %v3827_v2 = vrot.slane %v1095_v25, %v3600_v3 }
 0x64b   :  { %v1179_v8 = vadd.f32 %v3827_v2, %v1113_v56  ;;  %v1180_v14 = vadd.f32 %v3827_v2, %v1117_v4  ;;  %v1181_v10 = vadd.f32 %v3827_v2, %v1121_v19  ;;  %v1182_v17 = vadd.f32 %v3827_v2, %v1125_v11 }
 0x64c   :  { %v1183_v24 = vadd.f32 %v3827_v2, %v1129_v39  ;;  %v1184_v30 = vadd.f32 %v3827_v2, %v1133_v60  ;;  %v1185_v36 = vadd.f32 %v3827_v2, %v1137_v0  ;;  %v1186_v62 = vadd.f32 %v3827_v2, %v1141_v47 }
 0x64d   :  { %vm1195_vm0 = vcmp.gt.f32.partialorder %v1179_v8, 0.0  ;;  %v1211_v26 = vmul.f32 0.2, %v1179_v8  ;;  %v1212_v34 = vmul.f32 0.2, %v1180_v14  ;;  %vm1196_vm1 = vcmp.gt.f32.partialorder %v1180_v14, 0.0 }
 0x64e   :  { %v1213_v29 = vmul.f32 0.2, %v1181_v10  ;;  %vm1197_vm2 = vcmp.gt.f32.partialorder %v1181_v10, 0.0  ;;  %v1214_v23 = vmul.f32 0.2, %v1182_v17  ;;  %vm1198_vm3 = vcmp.gt.f32.partialorder %v1182_v17, 0.0 }
 0x64f   :  { %v1227_v5 = vsel %vm1195_vm0, %v1179_v8, %v1211_v26  ;;  %v1228_v22 = vsel %vm1196_vm1, %v1180_v14, %v1212_v34  ;;  %v1215_v48 = vmul.f32 0.2, %v1183_v24  ;;  %vm1199_vm4 = vcmp.gt.f32.partialorder %v1183_v24, 0.0 }
 0x650   :  { %v3833_v37 = vadd.f32 %v1227_v5, %v3607_v9  ;;  %v3838_v18 = vadd.f32 %v1228_v22, %v3613_v16  ;;  %v1229_v42 = vsel %vm1197_vm2, %v1181_v10, %v1213_v29  ;;  %v1230_v44 = vsel %vm1198_vm3, %v1182_v17, %v1214_v23 }
 0x651   :  { %v3843_v9 = vadd.f32 %v1229_v42, %v3620_v21  ;;  %v3848_v16 = vadd.f32 %v1230_v44, %v3627_v27  ;;  %v1231_v33 = vsel %vm1199_vm4, %v1183_v24, %v1215_v48  ;;  %v1216_v54 = vmul.f32 0.2, %v1184_v30 }
 0x652   :  { %1259 = vmax.xlane.f32.xlu0 %v3833_v37  ;;  %vm1200_vm5 = vcmp.gt.f32.partialorder %v1184_v30, 0.0  ;;  %v3853_v21 = vadd.f32 %v1231_v33, %v3634_v32  ;;  %v1217_v41 = vmul.f32 0.2, %v1185_v36  ;;  %vm1201_vm6 = vcmp.gt.f32.partialorder %v1185_v36, 0.0 }
 0x653   :  { %v1232_v52 = vsel %vm1200_vm5, %v1184_v30, %v1216_v54  ;;  %v1218_v46 = vmul.f32 0.2, %v1186_v62  ;;  %v1187_v6 = vadd.f32 %v3827_v2, %v1145_v31  ;;  %vm1202_vm7 = vcmp.gt.f32.partialorder %v1186_v62, 0.0 }
 0x654   :  { %v3858_v27 = vadd.f32 %v1232_v52, %v3641_v38  ;;  %v1233_v45 = vsel %vm1201_vm6, %v1185_v36, %v1217_v41  ;;  %v1188_v51 = vadd.f32 %v3827_v2, %v1149_v57  ;;  %v1157_v38 = vpop.permute.xlu0 %1156  ;;  %v1189_v56 = vadd.f32 %v3827_v2, %v3820_v20 }
 0x655   :  { %v3863_v32 = vadd.f32 %v1233_v45, %v3648_v43  ;;  %v1234_v15 = vsel %vm1202_vm7, %v1186_v62, %v1218_v46  ;;  %v1219_v50 = vmul.f32 0.2, %v1187_v6  ;;  %vm1203_vm8 = vcmp.gt.f32.partialorder %v1187_v6, 0.0 }
 0x656   :  { %1261 = vmax.xlane.f32.xlu0 %v3838_v18  ;;  %v3868_v7 = vadd.f32 %v1234_v15, %v3656_v49  ;;  %v1220_v53 = vmul.f32 0.2, %v1188_v51  ;;  %vm1204_vm9 = vcmp.gt.f32.partialorder %v1188_v51, 0.0  ;;  %v1221_v39 = vmul.f32 0.2, %v1189_v56 }
 0x657   :  { %v1235_v12 = vsel %vm1203_vm8, %v1187_v6, %v1219_v50  ;;  %v1190_v0 = vadd.f32 %v3827_v2, %v1157_v38  ;;  %vm1205_vm10 = vcmp.gt.f32.partialorder %v1189_v56, 0.0  ;;  %v1191_v20 = vadd.f32 %v3827_v2, %v3822_v58 }
 0x658   :  { %v3874_v43 = vadd.f32 %v1235_v12, %v3663_v55  ;;  %v1236_v19 = vsel %vm1204_vm9, %v1188_v51, %v1220_v53  ;;  %v1173_v31 = vpop.permute.xlu0 %1172  ;;  %v1237_v25 = vsel %vm1205_vm10, %v1189_v56, %v1221_v39  ;;  %v1193_v58 = vadd.f32 %v3827_v2, %v3824_v1 }
 0x659   :  { %v3879_v49 = vadd.f32 %v1236_v19, %v3671_v63  ;;  %v1222_v4 = vmul.f32 0.2, %v1190_v0  ;;  %vm1206_vm11 = vcmp.gt.f32.partialorder %v1190_v0, 0.0  ;;  %v3885_v8 = vadd.f32 %v1237_v25, %v3678_v59 }
 0x65a   :  { %1263 = vmax.xlane.f32.xlu0 %v3843_v9  ;;  %v1223_v26 = vmul.f32 0.2, %v1191_v20  ;;  %vm1207_vm12 = vcmp.gt.f32.partialorder %v1191_v20, 0.0  ;;  %v1225_v22 = vmul.f32 0.2, %v1193_v58  ;;  %v1194_v29 = vadd.f32 %v3827_v2, %v1173_v31 }
 0x65b   :  { %v1238_v14 = vsel %vm1206_vm11, %v1190_v0, %v1222_v4  ;;  %vm1209_vm14 = vcmp.gt.f32.partialorder %v1193_v58, 0.0 }
 0x65c   :  { %v1165_v55 = vpop.permute.xlu0 %1164  ;;  %v3890_v63 = vadd.f32 %v1238_v14, %v3686_v13  ;;  %v1239_v10 = vsel %vm1207_vm12, %v1191_v20, %v1223_v26  ;;  %v1241_v17 = vsel %vm1209_vm14, %v1193_v58, %v1225_v22  ;;  %v1226_v42 = vmul.f32 0.2, %v1194_v29 }
 0x65d   :  { %v1192_v34 = vadd.f32 %v3827_v2, %v1165_v55  ;;  %v3896_v59 = vadd.f32 %v1239_v10, %v3693_v61  ;;  %vm1210_vm15 = vcmp.gt.f32.partialorder %v1194_v29, 0.0  ;;  %v3905_v1 = vadd.f32 %v1241_v17, %v3708_v35 }
 0x65e   :  { %1265 = vmax.xlane.f32.xlu0 %v3848_v16  ;;  %v1242_v61 = vsel %vm1210_vm15, %v1194_v29, %v1226_v42 }
 0x65f   :  { %v1224_v5 = vmul.f32 0.2, %v1192_v34  ;;  %vm1208_vm13 = vcmp.gt.f32.partialorder %v1192_v34, 0.0  ;;  %v3909_v23 = vadd.f32 %v1242_v61, %v3714_v40 }
 0x661   :  { %v1240_v11 = vsel %vm1208_vm13, %v1192_v34, %v1224_v5 }
 0x662   :  { %1267 = vmax.xlane.f32.xlu0 %v3853_v21  ;;  %v3901_v13 = vadd.f32 %v1240_v11, %v3701_v28 }
 0x666   :  { %1269 = vmax.xlane.f32.xlu0 %v3858_v27 }
 0x66a   :  { %1271 = vmax.xlane.f32.xlu0 %v3863_v32 }
 0x66e   :  { %1273 = vmax.xlane.f32.xlu0 %v3868_v7 }
 0x672   :  { %1275 = vmax.xlane.f32.xlu0 %v3874_v43 }
 0x676   :  { %1277 = vmax.xlane.f32.xlu0 %v3879_v49 }
 0x67a   :  { %1279 = vmax.xlane.f32.xlu0 %v3885_v8 }
 0x67e   :  { %1281 = vmax.xlane.f32.xlu0 %v3890_v63 }
 0x682   :  { %1283 = vmax.xlane.f32.xlu0 %v3896_v59 }
 0x686   :  { %1285 = vmax.xlane.f32.xlu0 %v3901_v13 }
 0x68a   :  { %1287 = vmax.xlane.f32.xlu0 %v3905_v1 }
 0x68e   :  { %1289 = vmax.xlane.f32.xlu0 %v3909_v23 }
 0x6df   :  { %v1260_v2 = vpop.xlane.xlu0 %1259 }
 0x6e0   :  { %v1291_v28 = vsub.f32 %v3833_v37, %v1260_v2 }
 0x6e2   :  { %v1307_v24 = vmul.f32 1.442695, %v1291_v28 }
 0x6e3   :  { %v1262_v60 = vpop.xlane.xlu0 %1261 }
 0x6e4   :  { %3202 = vpow2.f32 %v1307_v24  ;;  %v1292_v44 = vsub.f32 %v3838_v18, %v1262_v60  ;;  %v3114_v24 = vld [vmem:[#allocation7 + $0x80] sm:$0xff]   ;;  %v3116_v60 = vld [vmem:[#allocation7 + $0x90] sm:$0xff]  }
 0x6e5   :  { %3014 = vmatprep.subr.bf16.mxu0 %v3114_v24 }
 0x6e6   :  { %v1309_v48 = vmul.f32 1.442695, %v1292_v44  ;;  %3015 = vmatpush3.bf16.msra.mxu0 %v3114_v24  ;;  %v3117_v44 = vld [vmem:[#allocation7 + $0x98] sm:$0xff]  }
 0x6e7   :  { %v1264_v30 = vpop.xlane.xlu0 %1263 }
 0x6e8   :  { %3204 = vpow2.f32 %v1309_v48  ;;  %v1293_v35 = vsub.f32 %v3843_v9, %v1264_v30  ;;  %v3118_v48 = vld [vmem:[#allocation7 + $0xa0] sm:$0xff]   ;;  %v3119_v30 = vld [vmem:[#allocation7 + $0xa8] sm:$0xff]  }
 0x6ea   :  { %v1311_v33 = vmul.f32 1.442695, %v1293_v35 }
 0x6eb   :  { %v1266_v54 = vpop.xlane.xlu0 %1265 }
 0x6ec   :  { %3206 = vpow2.f32 %v1311_v33  ;;  %v1294_v40 = vsub.f32 %v3848_v16, %v1266_v54 }
 0x6ee   :  { %v3916_v36 = vpop.eup %3202  ;;  %v1313_v47 = vmul.f32 1.442695, %v1294_v40 }
 0x6ef   :  { %1339 = vadd.xlane.f32.xlu0 %v3916_v36  ;;  %v1268_v37 = vpop.xlane.xlu0 %1267 }
 0x6f0   :  { %3208 = vpow2.f32 %v1313_v47  ;;  %v1295_v52 = vsub.f32 %v3853_v21, %v1268_v37 }
 0x6f2   :  { %v3920_v18 = vpop.eup %3204  ;;  %v1315_v41 = vmul.f32 1.442695, %v1295_v52 }
 0x6f3   :  { %1341 = vadd.xlane.f32.xlu0 %v3920_v18  ;;  %v1270_v9 = vpop.xlane.xlu0 %1269 }
 0x6f4   :  { %3210 = vpow2.f32 %v1315_v41  ;;  %v1296_v62 = vsub.f32 %v3858_v27, %v1270_v9 }
 0x6f6   :  { %v3924_v45 = vpop.eup %3206  ;;  %v1317_v16 = vmul.f32 1.442695, %v1296_v62 }
 0x6f7   :  { %1343 = vadd.xlane.f32.xlu1 %v3924_v45  ;;  %v1272_v46 = vpop.xlane.xlu0 %1271 }
 0x6f8   :  { %3212 = vpow2.f32 %v1317_v16  ;;  %v1297_v6 = vsub.f32 %v3863_v32, %v1272_v46 }
 0x6fa   :  { %v3928_v57 = vpop.eup %3208  ;;  %v1319_v21 = vmul.f32 1.442695, %v1297_v6 }
 0x6fb   :  { %1345 = vadd.xlane.f32.xlu0 %v3928_v57  ;;  %v1274_v15 = vpop.xlane.xlu0 %1273 }
 0x6fc   :  { %3214 = vpow2.f32 %v1319_v21  ;;  %v1298_v50 = vsub.f32 %v3868_v7, %v1274_v15 }
 0x6fe   :  { %v3932_v51 = vpop.eup %3210  ;;  %v1321_v27 = vmul.f32 1.442695, %v1298_v50 }
 0x6ff   :  { %1347 = vadd.xlane.f32.xlu0 %v3932_v51  ;;  %v1276_v38 = vpop.xlane.xlu0 %1275 }
 0x700   :  { %3216 = vpow2.f32 %v1321_v27  ;;  %v1299_v12 = vsub.f32 %v3874_v43, %v1276_v38 }
 0x702   :  { %v3936_v53 = vpop.eup %3212  ;;  %v1323_v32 = vmul.f32 1.442695, %v1299_v12 }
 0x703   :  { %1349 = vadd.xlane.f32.xlu0 %v3936_v53  ;;  %v1278_v56 = vpop.xlane.xlu0 %1277 }
 0x704   :  { %3218 = vpow2.f32 %v1323_v32  ;;  %v1300_v19 = vsub.f32 %v3879_v49, %v1278_v56 }
 0x706   :  { %v3940_v39 = vpop.eup %3214  ;;  %v1325_v7 = vmul.f32 1.442695, %v1300_v19 }
 0x707   :  { %1351 = vadd.xlane.f32.xlu0 %v3940_v39  ;;  %v1280_v0 = vpop.xlane.xlu0 %1279 }
 0x708   :  { %3220 = vpow2.f32 %v1325_v7  ;;  %v1301_v31 = vsub.f32 %v3885_v8, %v1280_v0 }
 0x70a   :  { %v3944_v25 = vpop.eup %3216  ;;  %v1327_v43 = vmul.f32 1.442695, %v1301_v31 }
 0x70b   :  { %1353 = vadd.xlane.f32.xlu0 %v3944_v25  ;;  %v1282_v4 = vpop.xlane.xlu0 %1281 }
 0x70c   :  { %3222 = vpow2.f32 %v1327_v43  ;;  %v1302_v20 = vsub.f32 %v3890_v63, %v1282_v4 }
 0x70e   :  { %v3948_v55 = vpop.eup %3218  ;;  %v1329_v49 = vmul.f32 1.442695, %v1302_v20 }
 0x70f   :  { %1355 = vadd.xlane.f32.xlu0 %v3948_v55  ;;  %v1284_v14 = vpop.xlane.xlu0 %1283 }
 0x710   :  { %3224 = vpow2.f32 %v1329_v49  ;;  %v1303_v26 = vsub.f32 %v3896_v59, %v1284_v14 }
 0x712   :  { %v3952_v34 = vpop.eup %3220  ;;  %v1331_v8 = vmul.f32 1.442695, %v1303_v26 }
 0x713   :  { %1357 = vadd.xlane.f32.xlu0 %v3952_v34  ;;  %v1286_v10 = vpop.xlane.xlu0 %1285 }
 0x714   :  { %3226 = vpow2.f32 %v1331_v8  ;;  %v1304_v5 = vsub.f32 %v3901_v13, %v1286_v10 }
 0x716   :  { %v3956_v58 = vpop.eup %3222  ;;  %v1333_v63 = vmul.f32 1.442695, %v1304_v5 }
 0x717   :  { %1359 = vadd.xlane.f32.xlu0 %v3956_v58  ;;  %v1288_v11 = vpop.xlane.xlu0 %1287 }
 0x718   :  { %3228 = vpow2.f32 %v1333_v63  ;;  %v1305_v22 = vsub.f32 %v3905_v1, %v1288_v11 }
 0x71a   :  { %v3960_v29 = vpop.eup %3224  ;;  %v1335_v59 = vmul.f32 1.442695, %v1305_v22 }
 0x71b   :  { %1361 = vadd.xlane.f32.xlu0 %v3960_v29  ;;  %v1290_v17 = vpop.xlane.xlu0 %1289 }
 0x71c   :  { %3230 = vpow2.f32 %v1335_v59  ;;  %v1306_v42 = vsub.f32 %v3909_v23, %v1290_v17  ;;  %v3115_v23 = vld [vmem:[#allocation7 + $0x88] sm:$0xff]  }
 0x71d   :  { %3016 = vmatprep.subr.bf16.mxu0 %v3115_v23 }
 0x71e   :  { %v3964_v61 = vpop.eup %3226  ;;  %v1337_v13 = vmul.f32 1.442695, %v1306_v42  ;;  %3017 = vmatpush3.bf16.msra.mxu0 %v3115_v23 }
 0x71f   :  { %1363 = vadd.xlane.f32.xlu0 %v3964_v61  ;;  %3018 = vmatprep.subr.bf16.mxu0 %v3116_v60 }
 0x720   :  { %3232 = vpow2.f32 %v1337_v13 }
 0x722   :  { %v3967_v2 = vpop.eup %3228  ;;  %3019 = vmatpush3.bf16.msra.mxu0 %v3116_v60 }
 0x723   :  { %1365 = vadd.xlane.f32.xlu1 %v3967_v2  ;;  %3020 = vmatprep.subr.bf16.mxu0 %v3117_v44 }
 0x726   :  { %v3970_v1 = vpop.eup %3230  ;;  %3021 = vmatpush3.bf16.msra.mxu0 %v3117_v44  ;;  %v3120_v44 = vld [vmem:[#allocation7 + $0xb0] sm:$0xff]  }
 0x727   :  { %1367 = vadd.xlane.f32.xlu0 %v3970_v1  ;;  %3022 = vmatprep.subr.bf16.mxu0 %v3118_v48 }
 0x72a   :  { %v3973_v28 = vpop.eup %3232  ;;  %3023 = vmatpush3.bf16.msra.mxu0 %v3118_v48  ;;  %v3121_v48 = vld [vmem:[#allocation7 + $0xb8] sm:$0xff]  }
 0x72b   :  { %1369 = vadd.xlane.f32.xlu1 %v3973_v28  ;;  %3024 = vmatprep.subr.bf16.mxu0 %v3119_v30 }
 0x72e   :  { %3025 = vmatpush3.bf16.msra.mxu0 %v3119_v30 }
 0x72f   :  { %3026 = vmatprep.subr.bf16.mxu0 %v3120_v44 }
 0x732   :  { %3027 = vmatpush3.bf16.msra.mxu0 %v3120_v44 }
 0x733   :  { %3028 = vmatprep.subr.bf16.mxu0 %v3121_v48 }
 0x736   :  { %3029 = vmatpush3.bf16.msra.mxu0 %v3121_v48 }
 0x77c   :  { %v1340_v35 = vpop.xlane.xlu0 %1339 }
 0x77d   :  { %3234 = vrcp.f32 %v1340_v35 }
 0x780   :  { %v1342_v33 = vpop.xlane.xlu0 %1341 }
 0x781   :  { %3236 = vrcp.f32 %v1342_v33 }
 0x784   :  { %v1344_v54 = vpop.xlane.xlu1 %1343 }
 0x785   :  { %3238 = vrcp.f32 %v1344_v54 }
 0x787   :  { %v3235_v47 = vpop.eup %3234 }
 0x788   :  { %v1346_v40 = vpop.xlane.xlu0 %1345  ;;  %v1387_v41 = vmul.f32 %v3235_v47, %v3916_v36 }
 0x789   :  { %3240 = vrcp.f32 %v1346_v40 }
 0x78b   :  { %v3237_v37 = vpop.eup %3236 }
 0x78c   :  { %v1348_v52 = vpop.xlane.xlu0 %1347  ;;  %v1388_v9 = vmul.f32 %v3237_v37, %v3920_v18 }
 0x78d   :  { %3242 = vrcp.f32 %v1348_v52 }
 0x78e   :  { %v1403_v62 = vpack.c.bf16 %v1388_v9, %v1387_v41 }
 0x78f   :  { %v3239_v46 = vpop.eup %3238 }
 0x790   :  { %2998 = vmatprep.mubr.bf16.mxu1 %v1403_v62  ;;  %v1350_v16 = vpop.xlane.xlu0 %1349  ;;  %v1389_v21 = vmul.f32 %v3239_v46, %v3924_v45 }
 0x791   :  { %3244 = vrcp.f32 %v1350_v16 }
 0x793   :  { %v3241_v6 = vpop.eup %3240 }
 0x794   :  { %v1390_v15 = vmul.f32 %v3241_v6, %v3928_v57  ;;  %v1352_v50 = vpop.xlane.xlu0 %1351 }
 0x795   :  { %3246 = vrcp.f32 %v1352_v50 }
 0x796   :  { %v1404_v27 = vpack.c.bf16 %v1390_v15, %v1389_v21 }
 0x797   :  { %v3243_v12 = vpop.eup %3242 }
 0x798   :  { %2999 = vmatmul.mubr.bf16.vlgmr.msra.gmra.mrb[16].mxu1 %v1404_v27  ;;  %v1354_v38 = vpop.xlane.xlu0 %1353  ;;  %v1391_v32 = vmul.f32 %v3243_v12, %v3932_v51 }
 0x799   :  { %3248 = vrcp.f32 %v1354_v38 }
 0x79b   :  { %v3245_v36 = vpop.eup %3244 }
 0x79c   :  { %v1356_v18 = vpop.xlane.xlu0 %1355  ;;  %v1392_v56 = vmul.f32 %v3245_v36, %v3936_v53 }
 0x79d   :  { %3250 = vrcp.f32 %v1356_v18 }
 0x79e   :  { %v1405_v19 = vpack.c.bf16 %v1392_v56, %v1391_v32 }
 0x79f   :  { %v3247_v45 = vpop.eup %3246 }
 0x7a0   :  { %3002 = vmatprep.mubr.bf16.mxu1 %v1405_v19  ;;  %v1358_v7 = vpop.xlane.xlu0 %1357  ;;  %v1393_v31 = vmul.f32 %v3247_v45, %v3940_v39 }
 0x7a1   :  { %3252 = vrcp.f32 %v1358_v7 }
 0x7a3   :  { %v3249_v57 = vpop.eup %3248 }
 0x7a4   :  { %v1360_v0 = vpop.xlane.xlu0 %1359  ;;  %v1394_v43 = vmul.f32 %v3249_v57, %v3944_v25 }
 0x7a5   :  { %3254 = vrcp.f32 %v1360_v0 }
 0x7a6   :  { %v1406_v4 = vpack.c.bf16 %v1394_v43, %v1393_v31 }
 0x7a7   :  { %v3251_v49 = vpop.eup %3250 }
 0x7a8   :  { %3003 = vmatmul.mubr.bf16.gmra.mrb[20].mxu1 %v1406_v4  ;;  %v1362_v20 = vpop.xlane.xlu0 %1361  ;;  %v1395_v14 = vmul.f32 %v3251_v49, %v3948_v55 }
 0x7a9   :  { %3256 = vrcp.f32 %v1362_v20 }
 0x7ab   :  { %v3253_v51 = vpop.eup %3252 }
 0x7ac   :  { %v1364_v53 = vpop.xlane.xlu0 %1363  ;;  %v1396_v26 = vmul.f32 %v3253_v51, %v3952_v34 }
 0x7ad   :  { %3258 = vrcp.f32 %v1364_v53 }
 0x7ae   :  { %v1407_v8 = vpack.c.bf16 %v1396_v26, %v1395_v14 }
 0x7af   :  { %v3255_v5 = vpop.eup %3254 }
 0x7b0   :  { %v1366_v10 = vpop.xlane.xlu1 %1365  ;;  %3006 = vmatprep.mubr.bf16.mxu1 %v1407_v8  ;;  %v1397_v63 = vmul.f32 %v3255_v5, %v3956_v58 }
 0x7b1   :  { %3260 = vrcp.f32 %v1366_v10 }
 0x7b3   :  { %v3257_v39 = vpop.eup %3256 }
 0x7b4   :  { %v1368_v25 = vpop.xlane.xlu0 %1367  ;;  %v1398_v11 = vmul.f32 %v3257_v39, %v3960_v29 }
 0x7b5   :  { %3262 = vrcp.f32 %v1368_v25 }
 0x7b6   :  { %v1408_v22 = vpack.c.bf16 %v1398_v11, %v1397_v63 }
 0x7b7   :  { %v3259_v17 = vpop.eup %3258 }
 0x7b8   :  { %v1370_v59 = vpop.xlane.xlu1 %1369  ;;  %3007 = vmatmul.mubr.bf16.gmra.mrb[24].mxu1 %v1408_v22  ;;  %v1399_v34 = vmul.f32 %v3259_v17, %v3964_v61  ;;  %v2740_v61 = vld [vmem:[%s4243_s3 + $0x1] ss:$0 sm:$0xff] }
 0x7b9   :  { %3264 = vrcp.f32 %v1370_v59 }
 0x7bb   :  { %v3261_v55 = vpop.eup %3260 }
 0x7bc   :  { %v1400_v42 = vmul.f32 %v3261_v55, %v3967_v2 }
 0x7be   :  { %v1409_v13 = vpack.c.bf16 %v1400_v42, %v1399_v34 }
 0x7bf   :  { %v3263_v24 = vpop.eup %3262 }
 0x7c0   :  { %3010 = vmatprep.mubr.bf16.mxu1 %v1409_v13  ;;  %v1401_v60 = vmul.f32 %v3263_v24, %v3970_v1 }
 0x7c3   :  { %v3265_v23 = vpop.eup %3264 }
 0x7c4   :  { %v1402_v58 = vmul.f32 %v3265_v23, %v3973_v28 }
 0x7c6   :  { %v1410_v29 = vpack.c.bf16 %v1402_v58, %v1401_v60 }
 0x7c8   :  { %3011 = vmatmul.mubr.bf16.gmra.mrb[28].mxu1 %v1410_v29 }
 0x86b   :  { %v3000_v2 = vpop.f32.mrb[16].mxu1 }
 0x86c   :  { %v1470_v30 = vadd.f32 %v3000_v2, %v2740_v61  ;;  %v1461_v35 = vpop.f32.mrb[17].mxu1 }
 0x86d   :  { %v1462_v33 = vadd.f32 %v2740_v61, %v1461_v35  ;;  %v3001_v54 = vpop.f32.mrb[18].mxu1 }
 0x86e   :  { %v1473_v1 = vadd.f32 %v3001_v54, %v2740_v61  ;;  %v1464_v40 = vpop.f32.mrb[19].mxu1  ;;  %v1526_v47 = vmax.f32 %v1470_v30, 0.0 }
 0x86f   :  { %v1465_v28 = vadd.f32 %v2740_v61, %v1464_v40  ;;  %v1524_v52 = vmax.f32 %v1462_v33, 0.0 }
 0x870   :  { %v1527_v37 = vmax.f32 %v1473_v1, 0.0 }
 0x871   :  { %v1525_v41 = vmax.f32 %v1465_v28, 0.0 }
 0x872   :  { %v1541_v9 = vpack.c.bf16 %v1527_v37, %v1526_v47 }
 0x873   :  { %v1540_v62 = vpack.c.bf16 %v1525_v41, %v1524_v52 }
 0x875   :  { %3030 = vmatprep.mubr.bf16.mxu0 %v1540_v62 }
 0x876   :  { %3031 = vmatmul.mubr.bf16.vlgmr.msra.gmra.mrb[32].mxu0 %v1541_v9 }
 0x87b   :  { %v3004_v16 = vpop.f32.mrb[20].mxu1 }
 0x87c   :  { %v1486_v46 = vadd.f32 %v3004_v16, %v2740_v61  ;;  %v1477_v6 = vpop.f32.mrb[21].mxu1 }
 0x87d   :  { %v1478_v21 = vadd.f32 %v2740_v61, %v1477_v6  ;;  %v3005_v15 = vpop.f32.mrb[22].mxu1 }
 0x87e   :  { %v1489_v50 = vadd.f32 %v3005_v15, %v2740_v61  ;;  %v1480_v27 = vpop.f32.mrb[23].mxu1  ;;  %v1530_v12 = vmax.f32 %v1486_v46, 0.0 }
 0x87f   :  { %v1481_v38 = vadd.f32 %v2740_v61, %v1480_v27  ;;  %v1528_v18 = vmax.f32 %v1478_v21, 0.0 }
 0x880   :  { %v1531_v36 = vmax.f32 %v1489_v50, 0.0 }
 0x881   :  { %v1529_v32 = vmax.f32 %v1481_v38, 0.0 }
 0x882   :  { %v1543_v56 = vpack.c.bf16 %v1531_v36, %v1530_v12 }
 0x883   :  { %v1542_v19 = vpack.c.bf16 %v1529_v32, %v1528_v18 }
 0x885   :  { %3034 = vmatprep.mubr.bf16.mxu0 %v1542_v19 }
 0x886   :  { %3035 = vmatmul.mubr.bf16.gmra.mrb[36].mxu0 %v1543_v56 }
 0x88b   :  { %v3008_v7 = vpop.f32.mrb[24].mxu1 }
 0x88c   :  { %v1502_v45 = vadd.f32 %v3008_v7, %v2740_v61  ;;  %v1493_v57 = vpop.f32.mrb[25].mxu1 }
 0x88d   :  { %v1494_v0 = vadd.f32 %v2740_v61, %v1493_v57  ;;  %v3009_v31 = vpop.f32.mrb[26].mxu1 }
 0x88e   :  { %v1505_v43 = vadd.f32 %v3009_v31, %v2740_v61  ;;  %v1496_v4 = vpop.f32.mrb[27].mxu1  ;;  %v1534_v49 = vmax.f32 %v1502_v45, 0.0 }
 0x88f   :  { %v1497_v20 = vadd.f32 %v2740_v61, %v1496_v4  ;;  %v1532_v53 = vmax.f32 %v1494_v0, 0.0 }
 0x890   :  { %v1535_v51 = vmax.f32 %v1505_v43, 0.0 }
 0x891   :  { %v1533_v14 = vmax.f32 %v1497_v20, 0.0 }
 0x892   :  { %v1545_v26 = vpack.c.bf16 %v1535_v51, %v1534_v49 }
 0x893   :  { %v1544_v8 = vpack.c.bf16 %v1533_v14, %v1532_v53 }
 0x895   :  { %3038 = vmatprep.mubr.bf16.mxu0 %v1544_v8 }
 0x896   :  { %3039 = vmatmul.mubr.bf16.gmra.mrb[40].mxu0 %v1545_v26 }
 0x89b   :  { %v3012_v10 = vpop.f32.mrb[28].mxu1 }
 0x89c   :  { %v1518_v5 = vadd.f32 %v3012_v10, %v2740_v61  ;;  %v1509_v39 = vpop.f32.mrb[29].mxu1 }
 0x89d   :  { %v1510_v25 = vadd.f32 %v2740_v61, %v1509_v39  ;;  %v3013_v63 = vpop.f32.mrb[30].mxu1 }
 0x89e   :  { %v1521_v11 = vadd.f32 %v3013_v63, %v2740_v61  ;;  %v1512_v22 = vpop.f32.mrb[31].mxu1  ;;  %v1538_v17 = vmax.f32 %v1518_v5, 0.0 }
 0x89f   :  { %v1513_v59 = vadd.f32 %v2740_v61, %v1512_v22  ;;  %v1536_v34 = vmax.f32 %v1510_v25, 0.0 }
 0x8a0   :  { %v1539_v55 = vmax.f32 %v1521_v11, 0.0 }
 0x8a1   :  { %v1537_v42 = vmax.f32 %v1513_v59, 0.0 }
 0x8a2   :  { %v1547_v13 = vpack.c.bf16 %v1539_v55, %v1538_v17  ;;  %v3330_v55 = vld [vmem:[#allocation5] sm:$0xff] }
 0x8a3   :  { %v1546_v24 = vpack.c.bf16 %v1537_v42, %v1536_v34 }
 0x8a5   :  { %3042 = vmatprep.mubr.bf16.mxu0 %v1546_v24  ;;  %v3331_v24 = vld [vmem:[#allocation5 + $0x8] sm:$0xff] }
 0x8a6   :  { %3043 = vmatmul.mubr.bf16.gmra.mrb[44].mxu0 %v1547_v13 }
 0x949   :  { %v3032_v23 = vpop.f32.mrb[32].mxu0 }
 0x94a   :  { %1730 = vrot.lane.b32.xlu1 %v3032_v23, %s3468_s1  ;;  %v1647_v60 = vpop.f32.mrb[33].mxu0 }
 0x94b   :  { %1726 = vrot.lane.b32.xlu0 %v1647_v60, %s3468_s1  ;;  %v3033_v58 = vpop.f32.mrb[34].mxu0 }
 0x94c   :  { %v2107_v29 = vpack.c.bf16 %v3033_v58, %v3032_v23  ;;  %v1650_v44 = vpop.f32.mrb[35].mxu0 }
 0x94d   :  { %v2106_v48 = vpack.c.bf16 %v1650_v44, %v1647_v60 }
 0x94e   :  { %1815 = vperm.xlu1 %3089, %v3032_v23  }
 0x94f   :  { %1732 = vrot.lane.b32.xlu0 %v3033_v58, %s3468_s1  ;;  %3046 = vmatprep.subr.bf16.mxu1 %v2106_v48 }
 0x950   :  { %3047 = vmatpush3.bf16.msra.mxu1 %v2106_v48  ;;  %v3332_v48 = vld [vmem:[#allocation5 + $0x10] sm:$0xff] }
 0x951   :  { %3048 = vmatprep.subr.bf16.mxu1 %v2107_v29 }
 0x952   :  { %1807 = vperm.xlu1 %3089, %v1647_v60  }
 0x953   :  { %1811 = vperm.xlu0 %3088, %v1650_v44  }
 0x954   :  { %3049 = vmatpush3.bf16.msra.mxu1 %v2107_v29 }
 0x956   :  { %1728 = vrot.lane.b32.xlu1 %v1650_v44, %s3468_s1 }
 0x959   :  { %v3036_v61 = vpop.f32.mrb[36].mxu0 }
 0x95a   :  { %1738 = vrot.lane.b32.xlu1 %v3036_v61, %s3468_s1  ;;  %v1663_v2 = vpop.f32.mrb[37].mxu0 }
 0x95b   :  { %v3037_v30 = vpop.f32.mrb[38].mxu0 }
 0x95c   :  { %v2109_v35 = vpack.c.bf16 %v3037_v30, %v3036_v61  ;;  %1740 = vrot.lane.b32.xlu0 %v3037_v30, %s3468_s1  ;;  %v1666_v33 = vpop.f32.mrb[39].mxu0 }
 0x95d   :  { %v2108_v54 = vpack.c.bf16 %v1666_v33, %v1663_v2 }
 0x95e   :  { %1734 = vrot.lane.b32.xlu1 %v1663_v2, %s3468_s1 }
 0x95f   :  { %3050 = vmatprep.subr.bf16.mxu1 %v2108_v54 }
 0x960   :  { %1736 = vrot.lane.b32.xlu0 %v1666_v33, %s3468_s1  ;;  %3051 = vmatpush3.bf16.msra.mxu1 %v2108_v54 }
 0x961   :  { %3052 = vmatprep.subr.bf16.mxu1 %v2109_v35 }
 0x964   :  { %3053 = vmatpush3.bf16.msra.mxu1 %v2109_v35 }
 0x969   :  { %v3040_v1 = vpop.f32.mrb[40].mxu0 }
 0x96a   :  { %1746 = vrot.lane.b32.xlu1 %v3040_v1, %s3468_s1  ;;  %v1679_v40 = vpop.f32.mrb[41].mxu0 }
 0x96b   :  { %v3041_v28 = vpop.f32.mrb[42].mxu0 }
 0x96c   :  { %v2111_v47 = vpack.c.bf16 %v3041_v28, %v3040_v1  ;;  %1748 = vrot.lane.b32.xlu0 %v3041_v28, %s3468_s1  ;;  %v1682_v37 = vpop.f32.mrb[43].mxu0 }
 0x96d   :  { %v2110_v52 = vpack.c.bf16 %v1682_v37, %v1679_v40 }
 0x96e   :  { %1742 = vrot.lane.b32.xlu1 %v1679_v40, %s3468_s1 }
 0x96f   :  { %3054 = vmatprep.subr.bf16.mxu1 %v2110_v52 }
 0x970   :  { %1744 = vrot.lane.b32.xlu0 %v1682_v37, %s3468_s1  ;;  %3055 = vmatpush3.bf16.msra.mxu1 %v2110_v52 }
 0x971   :  { %3056 = vmatprep.subr.bf16.mxu1 %v2111_v47 }
 0x974   :  { %3057 = vmatpush3.bf16.msra.mxu1 %v2111_v47 }
 0x979   :  { %v3044_v41 = vpop.f32.mrb[44].mxu0 }
 0x97a   :  { %1754 = vrot.lane.b32.xlu1 %v3044_v41, %s3468_s1  ;;  %v1695_v9 = vpop.f32.mrb[45].mxu0 }
 0x97b   :  { %v3045_v62 = vpop.f32.mrb[46].mxu0 }
 0x97c   :  { %v2113_v16 = vpack.c.bf16 %v3045_v62, %v3044_v41  ;;  %1756 = vrot.lane.b32.xlu0 %v3045_v62, %s3468_s1  ;;  %v1698_v46 = vpop.f32.mrb[47].mxu0 }
 0x97d   :  { %v2112_v6 = vpack.c.bf16 %v1698_v46, %v1695_v9 }
 0x97e   :  { %1750 = vrot.lane.b32.xlu1 %v1695_v9, %s3468_s1 }
 0x97f   :  { %3058 = vmatprep.subr.bf16.mxu1 %v2112_v6 }
 0x980   :  { %1752 = vrot.lane.b32.xlu0 %v1698_v46, %s3468_s1  ;;  %3059 = vmatpush3.bf16.msra.mxu1 %v2112_v6 }
 0x981   :  { %3060 = vmatprep.subr.bf16.mxu1 %v2113_v16 }
 0x982   :  { %1823 = vperm.xlu1 %3089, %v1663_v2  }
 0x984   :  { %1819 = vperm.xlu0 %3088, %v3033_v58   ;;  %3061 = vmatpush3.bf16.msra.mxu1 %v2113_v16  ;;  %v3335_v16 = vld [vmem:[#allocation5 + $0x28] sm:$0xff] }
 0x986   :  { %1831 = vperm.xlu1 %3089, %v3036_v61  }
 0x988   :  { %1827 = vperm.xlu0 %3088, %v1666_v33   ;;  %v3333_v33 = vld [vmem:[#allocation5 + $0x18] sm:$0xff] }
 0x98a   :  { %1839 = vperm.xlu1 %3089, %v1679_v40  }
 0x98c   :  { %1835 = vperm.xlu0 %3088, %v3037_v30  }
 0x98e   :  { %1847 = vperm.xlu1 %3089, %v3040_v1  }
 0x990   :  { %1843 = vperm.xlu0 %3088, %v1682_v37   ;;  %v3334_v37 = vld [vmem:[#allocation5 + $0x20] sm:$0xff] }
 0x992   :  { %1855 = vperm.xlu1 %3089, %v1695_v9  }
 0x994   :  { %1851 = vperm.xlu0 %3088, %v3041_v28  }
 0x996   :  { %1863 = vperm.xlu1 %3089, %v3044_v41  }
 0x998   :  { %1867 = vperm.xlu0 %3088, %v3045_v62  }
 0x99c   :  { %1859 = vperm.xlu0 %3088, %v1698_v46  }
 0x9bc   :  { %v1731_v15 = vpop.permute.xlu1 %1730 }
 0x9bd   :  { %v1727_v21 = vpop.permute.xlu0 %1726 }
 0x9bf   :  { %1774 = vxpose.xlu1.b32.start [1/16] (narrow) %v1727_v21, 8 }
 0x9c1   :  { %v1733_v38 = vpop.permute.xlu0 %1732 }
 0x9cd   :  { %v1816_v50 = vpop.permute.xlu1 %1815 }
 0x9d1   :  { %v1808_v27 = vpop.permute.xlu1 %1807 }
 0x9d2   :  { %v1812_v36 = vpop.permute.xlu0 %1811 }
 0x9d5   :  { %v1729_v12 = vpop.permute.xlu1 %1728 }
 0x9d6   :  { %1775 = vxpose.xlu1.b32.cont [2/16] (narrow) %v1729_v12, 8  ;;  %v1741_v32 = vpop.permute.xlu0 %1740 }
 0x9d9   :  { %v1739_v18 = vpop.permute.xlu1 %1738 }
 0x9da   :  { %1776 = vxpose.xlu1.b32.cont [3/16] (narrow) %v1731_v15, 8  ;;  %v1737_v19 = vpop.permute.xlu0 %1736 }
 0x9dd   :  { %v1735_v56 = vpop.permute.xlu1 %1734 }
 0x9de   :  { %1777 = vxpose.xlu1.b32.cont [4/16] (narrow) %v1733_v38, 8  ;;  %v1749_v45 = vpop.permute.xlu0 %1748 }
 0x9e1   :  { %v1747_v7 = vpop.permute.xlu1 %1746 }
 0x9e2   :  { %1778 = vxpose.xlu1.b32.cont [5/16] (narrow) %v1735_v56, 8  ;;  %v1745_v0 = vpop.permute.xlu0 %1744  ;;  %v3337_v56 = vld [vmem:[#allocation5 + $0x38] sm:$0xff] }
 0x9e5   :  { %v1743_v57 = vpop.permute.xlu1 %1742 }
 0x9e6   :  { %1779 = vxpose.xlu1.b32.cont [6/16] (narrow) %v1737_v19, 8 }
 0x9ea   :  { %1780 = vxpose.xlu1.b32.cont [7/16] (narrow) %v1739_v18, 8 }
 0x9ec   :  { %v1755_v31 = vpop.permute.xlu1 %1754 }
 0x9ee   :  { %1781 = vxpose.xlu1.b32.cont [8/16] (narrow) %v1741_v32, 8  ;;  %v1757_v43 = vpop.permute.xlu0 %1756 }
 0x9f0   :  { %v1751_v4 = vpop.permute.xlu1 %1750 }
 0x9f2   :  { %1782 = vxpose.xlu1.b32.cont [9/16] (narrow) %v1743_v57, 8  ;;  %v1753_v20 = vpop.permute.xlu0 %1752 }
 0x9f6   :  { %1783 = vxpose.xlu1.b32.cont [10/16] (narrow) %v1745_v0, 8  ;;  %v3338_v0 = vld [vmem:[#allocation5 + $0x40] sm:$0xff] }
 0x9fa   :  { %1784 = vxpose.xlu1.b32.cont [11/16] (narrow) %v1747_v7, 8 }
 0x9fe   :  { %1785 = vxpose.xlu1.b32.cont [12/16] (narrow) %v1749_v45, 8 }
 0xa01   :  { %v1824_v49 = vpop.permute.xlu1 %1823 }
 0xa02   :  { %1786 = vxpose.xlu1.b32.cont [13/16] (narrow) %v1751_v4, 8 }
 0xa03   :  { %v1820_v17 = vpop.permute.xlu0 %1819 }
 0xa05   :  { %v1832_v51 = vpop.permute.xlu1 %1831 }
 0xa06   :  { %1787 = vxpose.xlu1.b32.cont [14/16] (narrow) %v1753_v20, 8 }
 0xa07   :  { %v1828_v44 = vpop.permute.xlu0 %1827 }
 0xa09   :  { %v1840_v53 = vpop.permute.xlu1 %1839 }
 0xa0a   :  { %1788 = vxpose.xlu1.b32.cont [15/16] (narrow) %v1755_v31, 8 }
 0xa0b   :  { %v1836_v47 = vpop.permute.xlu0 %1835 }
 0xa0d   :  { %v4011_v14 = vpop.permute.xlu1 %1847 }
 0xa0e   :  { %1789 = vxpose.xlu1.b32.end [16/16] (narrow) %v1757_v43, 8 }
 0xa11   :  { %v4013_v26 = vpop.permute.xlu1 %1855 }
 0xa15   :  { %v4015_v8 = vpop.permute.xlu1 %1863 }
 0xa52   :  { %v1790_v10 = vpop.trf.xlu1 }
 0xa53   :  { %v4018_v5 = vrot.slane %v1790_v10, %v3600_v3 }
 0xa55   :  { %v1874_v39 = vadd.f32 %v4018_v5, %v1808_v27  ;;  %v1875_v25 = vadd.f32 %v4018_v5, %v1812_v36  ;;  %v1876_v22 = vadd.f32 %v4018_v5, %v1816_v50  ;;  %v1877_v3 = vadd.f32 %v4018_v5, %v1820_v17  ;;  %v1844_v50 = vpop.permute.xlu0 %1843  ;;  %v3336_v27 = vld [vmem:[#allocation5 + $0x30] sm:$0xff] }
 0xa56   :  { %v1878_v29 = vadd.f32 %v4018_v5, %v1824_v49  ;;  %v1879_v35 = vadd.f32 %v4018_v5, %v1828_v44  ;;  %v1880_v28 = vadd.f32 %v4018_v5, %v1832_v51  ;;  %v1881_v62 = vadd.f32 %v4018_v5, %v1836_v47  ;;  %v3339_v51 = vld [vmem:[#allocation5 + $0x48] sm:$0xff] }
 0xa57   :  { %vm1890_vm0 = vcmp.gt.f32.partialorder %v1874_v39, 0.0  ;;  %v1906_v63 = vmul.f32 0.2, %v1874_v39  ;;  %v1907_v11 = vmul.f32 0.2, %v1875_v25  ;;  %vm1891_vm1 = vcmp.gt.f32.partialorder %v1875_v25, 0.0 }
 0xa58   :  { %v1908_v13 = vmul.f32 0.2, %v1876_v22  ;;  %vm1892_vm2 = vcmp.gt.f32.partialorder %v1876_v22, 0.0  ;;  %v1909_v58 = vmul.f32 0.2, %v1877_v3  ;;  %vm1893_vm3 = vcmp.gt.f32.partialorder %v1877_v3, 0.0 }
 0xa59   :  { %v1922_v59 = vsel %vm1890_vm0, %v1874_v39, %v1906_v63  ;;  %v1923_v42 = vsel %vm1891_vm1, %v1875_v25, %v1907_v11  ;;  %v1910_v30 = vmul.f32 0.2, %v1878_v29  ;;  %vm1894_vm4 = vcmp.gt.f32.partialorder %v1878_v29, 0.0  ;;  %v1852_v32 = vpop.permute.xlu0 %1851  ;;  %v3340_v63 = vld [vmem:[#allocation5 + $0x50] sm:$0xff] }
 0xa5a   :  { %v4023_v34 = vadd.f32 %v3330_v55, %v1922_v59  ;;  %v4027_v23 = vadd.f32 %v3331_v24, %v1923_v42  ;;  %v1924_v60 = vsel %vm1892_vm2, %v1876_v22, %v1908_v13  ;;  %v1925_v2 = vsel %vm1893_vm3, %v1877_v3, %v1909_v58  ;;  %v3341_v55 = vld [vmem:[#allocation5 + $0x58] sm:$0xff]  ;;  %v3342_v24 = vld [vmem:[#allocation5 + $0x60] sm:$0xff] }
 0xa5b   :  { %v4031_v61 = vadd.f32 %v3332_v48, %v1924_v60  ;;  %v4035_v54 = vadd.f32 %v3333_v33, %v1925_v2  ;;  %v1926_v1 = vsel %vm1894_vm4, %v1878_v29, %v1910_v30  ;;  %v1911_v40 = vmul.f32 0.2, %v1879_v35  ;;  %v3343_v48 = vld [vmem:[#allocation5 + $0x68] sm:$0xff] }
 0xa5c   :  { %1954 = vmax.xlane.f32.xlu0 %v4023_v34  ;;  %vm1895_vm5 = vcmp.gt.f32.partialorder %v1879_v35, 0.0  ;;  %v4039_v52 = vadd.f32 %v3334_v37, %v1926_v1  ;;  %v1912_v9 = vmul.f32 0.2, %v1880_v28  ;;  %vm1896_vm6 = vcmp.gt.f32.partialorder %v1880_v28, 0.0 }
 0xa5d   :  { %v1927_v41 = vsel %vm1895_vm5, %v1879_v35, %v1911_v40  ;;  %v1913_v21 = vmul.f32 0.2, %v1881_v62  ;;  %v1882_v15 = vadd.f32 %v4018_v5, %v1840_v53  ;;  %vm1897_vm7 = vcmp.gt.f32.partialorder %v1881_v62, 0.0  ;;  %v1868_v49 = vpop.permute.xlu0 %1867  ;;  %v3345_v40 = vld [vmem:[#allocation5 + $0x78] sm:$0xff] }
 0xa5e   :  { %v4043_v46 = vadd.f32 %v3335_v16, %v1927_v41  ;;  %v1928_v6 = vsel %vm1896_vm6, %v1880_v28, %v1912_v9  ;;  %v1883_v18 = vadd.f32 %v4018_v5, %v1844_v50  ;;  %v1884_v57 = vadd.f32 %v4018_v5, %v4011_v14 }
 0xa5f   :  { %v4047_v38 = vadd.f32 %v3336_v27, %v1928_v6  ;;  %v1929_v12 = vsel %vm1897_vm7, %v1881_v62, %v1913_v21  ;;  %v1914_v36 = vmul.f32 0.2, %v1882_v15  ;;  %vm1898_vm8 = vcmp.gt.f32.partialorder %v1882_v15, 0.0 }
 0xa60   :  { %1956 = vmax.xlane.f32.xlu0 %v4027_v23  ;;  %v4051_v19 = vadd.f32 %v3337_v56, %v1929_v12  ;;  %v1915_v45 = vmul.f32 0.2, %v1883_v18  ;;  %vm1899_vm9 = vcmp.gt.f32.partialorder %v1883_v18, 0.0  ;;  %v1916_v4 = vmul.f32 0.2, %v1884_v57 }
 0xa61   :  { %v1930_v7 = vsel %vm1898_vm8, %v1882_v15, %v1914_v36  ;;  %v1885_v20 = vadd.f32 %v4018_v5, %v1852_v32  ;;  %vm1900_vm10 = vcmp.gt.f32.partialorder %v1884_v57, 0.0  ;;  %v1886_v14 = vadd.f32 %v4018_v5, %v4013_v26  ;;  %v1860_v25 = vpop.permute.xlu0 %1859 }
 0xa62   :  { %v4056_v31 = vadd.f32 %v3338_v0, %v1930_v7  ;;  %v1931_v43 = vsel %vm1899_vm9, %v1883_v18, %v1915_v45  ;;  %v1932_v10 = vsel %vm1900_vm10, %v1884_v57, %v1916_v4  ;;  %v1887_v17 = vadd.f32 %v4018_v5, %v1860_v25 }
 0xa63   :  { %v4060_v53 = vadd.f32 %v3339_v51, %v1931_v43  ;;  %v1917_v39 = vmul.f32 0.2, %v1885_v20  ;;  %vm1901_vm11 = vcmp.gt.f32.partialorder %v1885_v20, 0.0  ;;  %v4065_v11 = vadd.f32 %v3340_v63, %v1932_v10 }
 0xa64   :  { %1958 = vmax.xlane.f32.xlu0 %v4031_v61  ;;  %v1918_v59 = vmul.f32 0.2, %v1886_v14  ;;  %vm1902_vm12 = vcmp.gt.f32.partialorder %v1886_v14, 0.0  ;;  %v1919_v3 = vmul.f32 0.2, %v1887_v17  ;;  %v1888_v26 = vadd.f32 %v4018_v5, %v4015_v8  ;;  %v3344_v8 = vld [vmem:[#allocation5 + $0x70] sm:$0xff] }
 0xa65   :  { %v1933_v22 = vsel %vm1901_vm11, %v1885_v20, %v1917_v39  ;;  %vm1903_vm13 = vcmp.gt.f32.partialorder %v1887_v17, 0.0  ;;  %v1889_v44 = vadd.f32 %v4018_v5, %v1868_v49  ;;  %vm2460_vm0 = vcmask 1041409  }
 0xa66   :  { %v4069_v42 = vadd.f32 %v3341_v55, %v1933_v22  ;;  %v1934_v13 = vsel %vm1902_vm12, %v1886_v14, %v1918_v59  ;;  %v1935_v58 = vsel %vm1903_vm13, %v1887_v17, %v1919_v3  ;;  %v1920_v29 = vmul.f32 0.2, %v1888_v26 }
 0xa67   :  { %v4074_v60 = vadd.f32 %v3342_v24, %v1934_v13  ;;  %vm1904_vm14 = vcmp.gt.f32.partialorder %v1888_v26, 0.0  ;;  %v4078_v2 = vadd.f32 %v3343_v48, %v1935_v58  ;;  %v1921_v35 = vmul.f32 0.2, %v1889_v44 }
 0xa68   :  { %1960 = vmax.xlane.f32.xlu0 %v4035_v54  ;;  %v1936_v30 = vsel %vm1904_vm14, %v1888_v26, %v1920_v29  ;;  %vm1905_vm15 = vcmp.gt.f32.partialorder %v1889_v44, 0.0  ;;  %vm2462_vm1 = vcmask 1042434   ;;  %vm2464_vm2 = vcmask 1043459  }
 0xa69   :  { %v4081_v33 = vadd.f32 %v3344_v8, %v1936_v30  ;;  %v1937_v1 = vsel %vm1905_vm15, %v1889_v44, %v1921_v35  ;;  %vm2466_vm3 = vcmask 1044484   ;;  %vm2468_vm4 = vcmask 1045509  }
 0xa6a   :  { %v4084_v28 = vadd.f32 %v3345_v40, %v1937_v1  ;;  %vm2470_vm5 = vcmask 1046534   ;;  %vm2472_vm6 = vcmask 1047559  }
 0xa6c   :  { %1962 = vmax.xlane.f32.xlu0 %v4039_v52 }
 0xa70   :  { %1964 = vmax.xlane.f32.xlu0 %v4043_v46 }
 0xa74   :  { %1966 = vmax.xlane.f32.xlu0 %v4047_v38 }
 0xa78   :  { %1968 = vmax.xlane.f32.xlu0 %v4051_v19 }
 0xa7c   :  { %1970 = vmax.xlane.f32.xlu0 %v4056_v31 }
 0xa80   :  { %1972 = vmax.xlane.f32.xlu0 %v4060_v53 }
 0xa84   :  { %1974 = vmax.xlane.f32.xlu0 %v4065_v11 }
 0xa88   :  { %1976 = vmax.xlane.f32.xlu0 %v4069_v42 }
 0xa8c   :  { %1978 = vmax.xlane.f32.xlu0 %v4074_v60 }
 0xa90   :  { %1980 = vmax.xlane.f32.xlu0 %v4078_v2 }
 0xa94   :  { %1982 = vmax.xlane.f32.xlu0 %v4081_v33 }
 0xa98   :  { %1984 = vmax.xlane.f32.xlu0 %v4084_v28 }
 0xae9   :  { %v1955_v5 = vpop.xlane.xlu0 %1954 }
 0xaea   :  { %v1986_v47 = vsub.f32 %v4023_v34, %v1955_v5 }
 0xaec   :  { %v2002_v37 = vmul.f32 1.442695, %v1986_v47 }
 0xaed   :  { %v1957_v41 = vpop.xlane.xlu0 %1956 }
 0xaee   :  { %3266 = vpow2.f32 %v2002_v37  ;;  %v1987_v9 = vsub.f32 %v4027_v23, %v1957_v41 }
 0xaf0   :  { %v2004_v62 = vmul.f32 1.442695, %v1987_v9 }
 0xaf1   :  { %v1959_v16 = vpop.xlane.xlu0 %1958 }
 0xaf2   :  { %3268 = vpow2.f32 %v2004_v62  ;;  %v1988_v6 = vsub.f32 %v4031_v61, %v1959_v16 }
 0xaf4   :  { %v2006_v21 = vmul.f32 1.442695, %v1988_v6 }
 0xaf5   :  { %v1961_v15 = vpop.xlane.xlu0 %1960 }
 0xaf6   :  { %3270 = vpow2.f32 %v2006_v21  ;;  %v1989_v50 = vsub.f32 %v4035_v54, %v1961_v15 }
 0xaf8   :  { %v4091_v27 = vpop.eup %3266  ;;  %v2008_v12 = vmul.f32 1.442695, %v1989_v50 }
 0xaf9   :  { %2034 = vadd.xlane.f32.xlu0 %v4091_v27  ;;  %v1963_v34 = vpop.xlane.xlu0 %1962 }
 0xafa   :  { %3272 = vpow2.f32 %v2008_v12  ;;  %v1990_v36 = vsub.f32 %v4039_v52, %v1963_v34 }
 0xafc   :  { %v4095_v23 = vpop.eup %3268  ;;  %v2010_v18 = vmul.f32 1.442695, %v1990_v36 }
 0xafd   :  { %2036 = vadd.xlane.f32.xlu0 %v4095_v23  ;;  %v1965_v61 = vpop.xlane.xlu0 %1964 }
 0xafe   :  { %3274 = vpow2.f32 %v2010_v18  ;;  %v1991_v32 = vsub.f32 %v4043_v46, %v1965_v61 }
 0xb00   :  { %v4099_v56 = vpop.eup %3270  ;;  %v2012_v54 = vmul.f32 1.442695, %v1991_v32 }
 0xb01   :  { %2038 = vadd.xlane.f32.xlu1 %v4099_v56  ;;  %v1967_v7 = vpop.xlane.xlu0 %1966 }
 0xb02   :  { %3276 = vpow2.f32 %v2012_v54  ;;  %v1992_v45 = vsub.f32 %v4047_v38, %v1967_v7 }
 0xb04   :  { %v4103_v57 = vpop.eup %3272  ;;  %v2014_v52 = vmul.f32 1.442695, %v1992_v45 }
 0xb05   :  { %2040 = vadd.xlane.f32.xlu0 %v4103_v57  ;;  %v1969_v0 = vpop.xlane.xlu0 %1968 }
 0xb06   :  { %3278 = vpow2.f32 %v2014_v52  ;;  %v1993_v43 = vsub.f32 %v4051_v19, %v1969_v0 }
 0xb08   :  { %v4107_v4 = vpop.eup %3274  ;;  %v2016_v46 = vmul.f32 1.442695, %v1993_v43 }
 0xb09   :  { %2042 = vadd.xlane.f32.xlu0 %v4107_v4  ;;  %v1971_v20 = vpop.xlane.xlu0 %1970 }
 0xb0a   :  { %3280 = vpow2.f32 %v2016_v46  ;;  %v1994_v49 = vsub.f32 %v4056_v31, %v1971_v20 }
 0xb0c   :  { %v4111_v51 = vpop.eup %3276  ;;  %v2018_v38 = vmul.f32 1.442695, %v1994_v49 }
 0xb0d   :  { %2044 = vadd.xlane.f32.xlu0 %v4111_v51  ;;  %v1973_v10 = vpop.xlane.xlu0 %1972 }
 0xb0e   :  { %3282 = vpow2.f32 %v2018_v38  ;;  %v1995_v39 = vsub.f32 %v4060_v53, %v1973_v10 }
 0xb10   :  { %v4115_v14 = vpop.eup %3278  ;;  %v2020_v19 = vmul.f32 1.442695, %v1995_v39 }
 0xb11   :  { %2046 = vadd.xlane.f32.xlu0 %v4115_v14  ;;  %v1975_v25 = vpop.xlane.xlu0 %1974 }
 0xb12   :  { %3284 = vpow2.f32 %v2020_v19  ;;  %v1996_v63 = vsub.f32 %v4065_v11, %v1975_v25 }
 0xb14   :  { %v4119_v22 = vpop.eup %3280  ;;  %v2022_v31 = vmul.f32 1.442695, %v1996_v63 }
 0xb15   :  { %2048 = vadd.xlane.f32.xlu0 %v4119_v22  ;;  %v1977_v59 = vpop.xlane.xlu0 %1976 }
 0xb16   :  { %3286 = vpow2.f32 %v2022_v31  ;;  %v1997_v17 = vsub.f32 %v4069_v42, %v1977_v59 }
 0xb18   :  { %v4123_v55 = vpop.eup %3282  ;;  %v2024_v53 = vmul.f32 1.442695, %v1997_v17 }
 0xb19   :  { %2050 = vadd.xlane.f32.xlu0 %v4123_v55  ;;  %v1979_v13 = vpop.xlane.xlu0 %1978 }
 0xb1a   :  { %3288 = vpow2.f32 %v2024_v53  ;;  %v1998_v3 = vsub.f32 %v4074_v60, %v1979_v13 }
 0xb1c   :  { %v4127_v26 = vpop.eup %3284  ;;  %v2026_v11 = vmul.f32 1.442695, %v1998_v3 }
 0xb1d   :  { %2052 = vadd.xlane.f32.xlu0 %v4127_v26  ;;  %v1981_v24 = vpop.xlane.xlu0 %1980 }
 0xb1e   :  { %3290 = vpow2.f32 %v2026_v11  ;;  %v1999_v58 = vsub.f32 %v4078_v2, %v1981_v24 }
 0xb20   :  { %v4131_v29 = vpop.eup %3286  ;;  %v2028_v42 = vmul.f32 1.442695, %v1999_v58 }
 0xb21   :  { %2054 = vadd.xlane.f32.xlu0 %v4131_v29  ;;  %v1983_v44 = vpop.xlane.xlu0 %1982 }
 0xb22   :  { %3292 = vpow2.f32 %v2028_v42  ;;  %v2000_v48 = vsub.f32 %v4081_v33, %v1983_v44 }
 0xb24   :  { %v4135_v30 = vpop.eup %3288  ;;  %v2030_v60 = vmul.f32 1.442695, %v2000_v48 }
 0xb25   :  { %2056 = vadd.xlane.f32.xlu0 %v4135_v30  ;;  %v1985_v35 = vpop.xlane.xlu0 %1984 }
 0xb26   :  { %3294 = vpow2.f32 %v2030_v60  ;;  %v2001_v8 = vsub.f32 %v4084_v28, %v1985_v35  ;;  %v3122_v60 = vld [vmem:[#allocation8 + $0x40] sm:$0xff]  }
 0xb27   :  { %v3123_v35 = vld [vmem:[#allocation8] sm:$0xff]   ;;  %2864 = vmatprep.subr.bf16.mxu0 %v3122_v60 }
 0xb28   :  { %v4139_v1 = vpop.eup %3290  ;;  %v2032_v2 = vmul.f32 1.442695, %v2001_v8  ;;  %v3124_v8 = vld [vmem:[#allocation8 + $0x48] sm:$0xff]   ;;  %2865 = vmatpush3.bf16.msra.mxu0 %v3123_v35 }
 0xb29   :  { %2058 = vadd.xlane.f32.xlu0 %v4139_v1  ;;  %2866 = vmatprep.subr.bf16.mxu0 %v3124_v8 }
 0xb2a   :  { %3296 = vpow2.f32 %v2032_v2  ;;  %v3125_v2 = vld [vmem:[#allocation8 + $0x8] sm:$0xff]  }
 0xb2c   :  { %v4142_v40 = vpop.eup %3292  ;;  %2867 = vmatpush3.bf16.msra.mxu0 %v3125_v2 }
 0xb2d   :  { %2060 = vadd.xlane.f32.xlu1 %v4142_v40 }
 0xb30   :  { %v4145_v33 = vpop.eup %3294 }
 0xb31   :  { %2062 = vadd.xlane.f32.xlu0 %v4145_v33 }
 0xb34   :  { %v4148_v5 = vpop.eup %3296 }
 0xb35   :  { %2064 = vadd.xlane.f32.xlu1 %v4148_v5 }
 0xb86   :  { %v2035_v47 = vpop.xlane.xlu0 %2034 }
 0xb87   :  { %3298 = vrcp.f32 %v2035_v47  ;;  %v3128_v47 = vld [vmem:[#allocation8 + $0x58] sm:$0xff]  }
 0xb8a   :  { %v2037_v28 = vpop.xlane.xlu0 %2036 }
 0xb8b   :  { %3300 = vrcp.f32 %v2037_v28  ;;  %v3129_v28 = vld [vmem:[#allocation8 + $0x18] sm:$0xff]  }
 0xb8e   :  { %v2039_v37 = vpop.xlane.xlu1 %2038 }
 0xb8f   :  { %3302 = vrcp.f32 %v2039_v37  ;;  %v3132_v37 = vld [vmem:[#allocation8 + $0x68] sm:$0xff]  }
 0xb91   :  { %v3299_v9 = vpop.eup %3298 }
 0xb92   :  { %v2041_v41 = vpop.xlane.xlu0 %2040  ;;  %v2082_v6 = vmul.f32 %v3299_v9, %v4091_v27  ;;  %v3134_v9 = vld [vmem:[#allocation8 + $0x70] sm:$0xff]  }
 0xb93   :  { %3304 = vrcp.f32 %v2041_v41  ;;  %v3133_v41 = vld [vmem:[#allocation8 + $0x28] sm:$0xff]  }
 0xb95   :  { %v3301_v62 = vpop.eup %3300 }
 0xb96   :  { %v2043_v16 = vpop.xlane.xlu0 %2042  ;;  %v2083_v21 = vmul.f32 %v3301_v62, %v4095_v23  ;;  %v3135_v62 = vld [vmem:[#allocation8 + $0x30] sm:$0xff]  }
 0xb97   :  { %3306 = vrcp.f32 %v2043_v16  ;;  %v3136_v16 = vld [vmem:[#allocation8 + $0x78] sm:$0xff]  }
 0xb98   :  { %v2098_v15 = vpack.c.bf16 %v2083_v21, %v2082_v6  ;;  %v3137_v6 = vld [vmem:[#allocation8 + $0x38] sm:$0xff]   ;;  %v4170_v21 = vld [vmem:[%s4243_s3 + $0x2] ss:$0 sm:$0xff] }
 0xb99   :  { %v3303_v12 = vpop.eup %3302 }
 0xb9a   :  { %3062 = vmatprep.mubr.bf16.mxu1 %v2098_v15  ;;  %v2045_v50 = vpop.xlane.xlu0 %2044  ;;  %v2084_v36 = vmul.f32 %v3303_v12, %v4099_v56 }
 0xb9b   :  { %3308 = vrcp.f32 %v2045_v50 }
 0xb9d   :  { %v3305_v34 = vpop.eup %3304 }
 0xb9e   :  { %v2085_v18 = vmul.f32 %v3305_v34, %v4103_v57  ;;  %v2047_v61 = vpop.xlane.xlu0 %2046 }
 0xb9f   :  { %3310 = vrcp.f32 %v2047_v61 }
 0xba0   :  { %v2099_v32 = vpack.c.bf16 %v2085_v18, %v2084_v36 }
 0xba1   :  { %v3307_v7 = vpop.eup %3306 }
 0xba2   :  { %3063 = vmatmul.mubr.bf16.vlgmr.msra.gmra.mrb[32].mxu1 %v2099_v32  ;;  %v2049_v54 = vpop.xlane.xlu0 %2048  ;;  %v2086_v45 = vmul.f32 %v3307_v7, %v4107_v4 }
 0xba3   :  { %3312 = vrcp.f32 %v2049_v54 }
 0xba5   :  { %v3309_v27 = vpop.eup %3308 }
 0xba6   :  { %v2051_v23 = vpop.xlane.xlu0 %2050  ;;  %v2087_v52 = vmul.f32 %v3309_v27, %v4111_v51 }
 0xba7   :  { %3314 = vrcp.f32 %v2051_v23 }
 0xba8   :  { %v2100_v0 = vpack.c.bf16 %v2087_v52, %v2086_v45 }
 0xba9   :  { %v3311_v56 = vpop.eup %3310 }
 0xbaa   :  { %3066 = vmatprep.mubr.bf16.mxu1 %v2100_v0  ;;  %v2053_v43 = vpop.xlane.xlu0 %2052  ;;  %v2088_v20 = vmul.f32 %v3311_v56, %v4115_v14 }
 0xbab   :  { %3316 = vrcp.f32 %v2053_v43 }
 0xbad   :  { %v3313_v57 = vpop.eup %3312 }
 0xbae   :  { %v2055_v46 = vpop.xlane.xlu0 %2054  ;;  %v2089_v49 = vmul.f32 %v3313_v57, %v4119_v22 }
 0xbaf   :  { %3318 = vrcp.f32 %v2055_v46 }
 0xbb0   :  { %v2101_v38 = vpack.c.bf16 %v2089_v49, %v2088_v20 }
 0xbb1   :  { %v3315_v39 = vpop.eup %3314 }
 0xbb2   :  { %3067 = vmatmul.mubr.bf16.gmra.mrb[36].mxu1 %v2101_v38  ;;  %v2057_v10 = vpop.xlane.xlu0 %2056  ;;  %v2090_v19 = vmul.f32 %v3315_v39, %v4123_v55 }
 0xbb3   :  { %3320 = vrcp.f32 %v2057_v10 }
 0xbb5   :  { %v3317_v4 = vpop.eup %3316 }
 0xbb6   :  { %v2059_v51 = vpop.xlane.xlu0 %2058  ;;  %v2091_v25 = vmul.f32 %v3317_v4, %v4127_v26 }
 0xbb7   :  { %3322 = vrcp.f32 %v2059_v51 }
 0xbb8   :  { %v2102_v63 = vpack.c.bf16 %v2091_v25, %v2090_v19 }
 0xbb9   :  { %v3319_v59 = vpop.eup %3318 }
 0xbba   :  { %v2061_v31 = vpop.xlane.xlu1 %2060  ;;  %3070 = vmatprep.mubr.bf16.mxu1 %v2102_v63  ;;  %v2092_v17 = vmul.f32 %v3319_v59, %v4131_v29 }
 0xbbb   :  { %3324 = vrcp.f32 %v2061_v31 }
 0xbbd   :  { %v3321_v14 = vpop.eup %3320 }
 0xbbe   :  { %v2063_v22 = vpop.xlane.xlu0 %2062  ;;  %v2093_v53 = vmul.f32 %v3321_v14, %v4135_v30 }
 0xbbf   :  { %3326 = vrcp.f32 %v2063_v22 }
 0xbc0   :  { %v2103_v13 = vpack.c.bf16 %v2093_v53, %v2092_v17 }
 0xbc1   :  { %v3323_v11 = vpop.eup %3322 }
 0xbc2   :  { %v2065_v3 = vpop.xlane.xlu1 %2064  ;;  %3071 = vmatmul.mubr.bf16.gmra.mrb[40].mxu1 %v2103_v13  ;;  %v2094_v26 = vmul.f32 %v3323_v11, %v4139_v1  ;;  %v3126_v1 = vld [vmem:[#allocation8 + $0x50] sm:$0xff]  }
 0xbc3   :  { %3328 = vrcp.f32 %v2065_v3  ;;  %2868 = vmatprep.subr.bf16.mxu0 %v3126_v1 }
 0xbc5   :  { %v3325_v55 = vpop.eup %3324 }
 0xbc6   :  { %v2095_v24 = vmul.f32 %v3325_v55, %v4142_v40  ;;  %v3127_v40 = vld [vmem:[#allocation8 + $0x10] sm:$0xff]  }
 0xbc7   :  { %2869 = vmatpush3.bf16.msra.mxu0 %v3127_v40 }
 0xbc8   :  { %v2104_v58 = vpack.c.bf16 %v2095_v24, %v2094_v26  ;;  %2870 = vmatprep.subr.bf16.mxu0 %v3128_v47 }
 0xbc9   :  { %v3327_v42 = vpop.eup %3326 }
 0xbca   :  { %3074 = vmatprep.mubr.bf16.mxu1 %v2104_v58  ;;  %v2096_v48 = vmul.f32 %v3327_v42, %v4145_v33  ;;  %v3130_v33 = vld [vmem:[#allocation8 + $0x60] sm:$0xff]  }
 0xbcb   :  { %2871 = vmatpush3.bf16.msra.mxu0 %v3129_v28 }
 0xbcc   :  { %2872 = vmatprep.subr.bf16.mxu0 %v3130_v33 }
 0xbcd   :  { %v3329_v44 = vpop.eup %3328 }
 0xbce   :  { %v2097_v29 = vmul.f32 %v3329_v44, %v4148_v5  ;;  %v3131_v5 = vld [vmem:[#allocation8 + $0x20] sm:$0xff]  }
 0xbcf   :  { %2873 = vmatpush3.bf16.msra.mxu0 %v3131_v5 }
 0xbd0   :  { %v2105_v30 = vpack.c.bf16 %v2097_v29, %v2096_v48  ;;  %2874 = vmatprep.subr.bf16.mxu0 %v3132_v37 }
 0xbd2   :  { %3075 = vmatmul.mubr.bf16.gmra.mrb[44].mxu1 %v2105_v30 }
 0xbd3   :  { %2875 = vmatpush3.bf16.msra.mxu0 %v3133_v41 }
 0xbd4   :  { %2876 = vmatprep.subr.bf16.mxu0 %v3134_v9 }
 0xbd7   :  { %2877 = vmatpush3.bf16.msra.mxu0 %v3135_v62 }
 0xbd8   :  { %2878 = vmatprep.subr.bf16.mxu0 %v3136_v16 }
 0xbdb   :  { %2879 = vmatpush3.bf16.msra.mxu0 %v3137_v6 }
 0xc75   :  { %v3064_v15 = vpop.f32.mrb[32].mxu1 }
 0xc76   :  { %v2165_v50 = vadd.f32 %v3064_v15, %v4170_v21  ;;  %v2156_v12 = vpop.f32.mrb[33].mxu1 }
 0xc77   :  { %v2157_v34 = vadd.f32 %v4170_v21, %v2156_v12  ;;  %v3065_v36 = vpop.f32.mrb[34].mxu1 }
 0xc78   :  { %v2221_v18 = vmax.f32 %v2165_v50, 0.0  ;;  %v2168_v61 = vadd.f32 %v3065_v36, %v4170_v21  ;;  %v2159_v32 = vpop.f32.mrb[35].mxu1 }
 0xc79   :  { %v2219_v54 = vmax.f32 %v2157_v34, 0.0  ;;  %v2160_v7 = vadd.f32 %v4170_v21, %v2159_v32 }
 0xc7a   :  { %v2247_v27 = vrot.slane %v2221_v18, 4  ;;  %v2222_v23 = vmax.f32 %v2168_v61, 0.0 }
 0xc7b   :  { %v2235_v45 = vrot.slane %v2219_v54, 4  ;;  %v2220_v52 = vmax.f32 %v2160_v7, 0.0 }
 0xc7c   :  { %v2248_v0 = vadd.f32 %v2247_v27, %v2221_v18  ;;  %v2361_v43 = vmax.f32 %v2221_v18, %v2247_v27  ;;  %v2253_v56 = vrot.slane %v2222_v23, 4 }
 0xc7d   :  { %v2236_v57 = vadd.f32 %v2235_v45, %v2219_v54  ;;  %v2349_v46 = vmax.f32 %v2219_v54, %v2235_v45  ;;  %v2241_v20 = vrot.slane %v2220_v52, 4 }
 0xc7e   :  { %v2249_v49 = vrot.slane %v2248_v0, 2  ;;  %v2362_v38 = vrot.slane %v2361_v43, 2  ;;  %v2254_v10 = vadd.f32 %v2253_v56, %v2222_v23  ;;  %v2367_v39 = vmax.f32 %v2222_v23, %v2253_v56 }
 0xc7f   :  { %v2237_v4 = vrot.slane %v2236_v57, 2  ;;  %v2350_v51 = vrot.slane %v2349_v46, 2  ;;  %v2242_v19 = vadd.f32 %v2241_v20, %v2220_v52  ;;  %v2355_v25 = vmax.f32 %v2220_v52, %v2241_v20 }
 0xc80   :  { %v2250_v63 = vadd.f32 %v2249_v49, %v2248_v0  ;;  %v2363_v31 = vmax.f32 %v2361_v43, %v2362_v38  ;;  %v2255_v59 = vrot.slane %v2254_v10, 2  ;;  %v2368_v14 = vrot.slane %v2367_v39, 2 }
 0xc81   :  { %v2238_v22 = vadd.f32 %v2237_v4, %v2236_v57  ;;  %v2351_v17 = vmax.f32 %v2349_v46, %v2350_v51  ;;  %v2243_v53 = vrot.slane %v2242_v19, 2  ;;  %v2356_v13 = vrot.slane %v2355_v25, 2 }
 0xc82   :  { %v2251_v3 = vrot.slane %v2250_v63, 1  ;;  %v2364_v11 = vrot.slane %v2363_v31, 1  ;;  %v2256_v55 = vadd.f32 %v2255_v59, %v2254_v10  ;;  %v2369_v26 = vmax.f32 %v2367_v39, %v2368_v14 }
 0xc83   :  { %v2239_v24 = vrot.slane %v2238_v22, 1  ;;  %v2352_v58 = vrot.slane %v2351_v17, 1  ;;  %v2244_v42 = vadd.f32 %v2243_v53, %v2242_v19  ;;  %v2357_v44 = vmax.f32 %v2355_v25, %v2356_v13 }
 0xc84   :  { %v2252_v48 = vadd.f32 %v2251_v3, %v2250_v63  ;;  %v2257_v29 = vrot.slane %v2256_v55, 1  ;;  %v2370_v30 = vrot.slane %v2369_v26, 1  ;;  %v2365_v1 = vmax.f32 %v2363_v31, %v2364_v11 }
 0xc85   :  { %v2240_v60 = vadd.f32 %v2239_v24, %v2238_v22  ;;  %v2245_v35 = vrot.slane %v2244_v42, 1  ;;  %v2358_v8 = vrot.slane %v2357_v44, 1  ;;  %v3068_v2 = vpop.f32.mrb[36].mxu1  ;;  %v2353_v40 = vmax.f32 %v2351_v17, %v2352_v58 }
 0xc86   :  { %v2258_v47 = vadd.f32 %v2257_v29, %v2256_v55  ;;  %v2181_v28 = vadd.f32 %v3068_v2, %v4170_v21  ;;  %v2172_v33 = vpop.f32.mrb[37].mxu1  ;;  %v2334_v5 = vmul.f32 0.125, %v2252_v48  ;;  %v2371_v6 = vmax.f32 %v2369_v26, %v2370_v30 }
 0xc87   :  { %v2246_v37 = vadd.f32 %v2245_v35, %v2244_v42  ;;  %v2359_v41 = vmax.f32 %v2357_v44, %v2358_v8  ;;  %v2173_v9 = vadd.f32 %v4170_v21, %v2172_v33  ;;  %v3069_v62 = vpop.f32.mrb[38].mxu1  ;;  %v2332_v16 = vmul.f32 0.125, %v2240_v60 }
 0xc88   :  { %v2225_v15 = vmax.f32 %v2181_v28, 0.0  ;;  %v2184_v50 = vadd.f32 %v3069_v62, %v4170_v21  ;;  %v2175_v12 = vpop.f32.mrb[39].mxu1  ;;  %v2335_v32 = vmul.f32 0.125, %v2258_v47 }
 0xc89   :  { %v2333_v34 = vmul.f32 0.125, %v2246_v37  ;;  %v2499_v36 = vsel %vm2460_vm0, %v2359_v41, %v2353_v40  ;;  %v2223_v18 = vmax.f32 %v2173_v9, 0.0  ;;  %v2176_v61 = vadd.f32 %v4170_v21, %v2175_v12 }
 0xc8a   :  { %v2271_v54 = vrot.slane %v2225_v15, 4  ;;  %v2226_v7 = vmax.f32 %v2184_v50, 0.0  ;;  %v2500_v27 = vsel %vm2462_vm1, %v2365_v1, %v2499_v36 }
 0xc8b   :  { %v2461_v23 = vsel %vm2460_vm0, %v2333_v34, %v2332_v16  ;;  %v2259_v45 = vrot.slane %v2223_v18, 4  ;;  %v2224_v52 = vmax.f32 %v2176_v61, 0.0  ;;  %v2501_v0 = vsel %vm2464_vm2, %v2371_v6, %v2500_v27 }
 0xc8c   :  { %v2463_v43 = vsel %vm2462_vm1, %v2334_v5, %v2461_v23  ;;  %v2272_v56 = vadd.f32 %v2271_v54, %v2225_v15  ;;  %v2385_v57 = vmax.f32 %v2225_v15, %v2271_v54  ;;  %v2277_v46 = vrot.slane %v2226_v7, 4 }
 0xc8d   :  { %v2260_v20 = vadd.f32 %v2259_v45, %v2223_v18  ;;  %v2373_v49 = vmax.f32 %v2223_v18, %v2259_v45  ;;  %v2465_v38 = vsel %vm2464_vm2, %v2335_v32, %v2463_v43  ;;  %v2265_v10 = vrot.slane %v2224_v52, 4 }
 0xc8e   :  { %v2273_v39 = vrot.slane %v2272_v56, 2  ;;  %v2386_v4 = vrot.slane %v2385_v57, 2  ;;  %v2278_v51 = vadd.f32 %v2277_v46, %v2226_v7  ;;  %v2391_v19 = vmax.f32 %v2226_v7, %v2277_v46 }
 0xc8f   :  { %v2261_v25 = vrot.slane %v2260_v20, 2  ;;  %v2374_v63 = vrot.slane %v2373_v49, 2  ;;  %v2266_v31 = vadd.f32 %v2265_v10, %v2224_v52  ;;  %v2379_v59 = vmax.f32 %v2224_v52, %v2265_v10 }
 0xc90   :  { %v2274_v14 = vadd.f32 %v2273_v39, %v2272_v56  ;;  %v2387_v22 = vmax.f32 %v2385_v57, %v2386_v4  ;;  %v2279_v17 = vrot.slane %v2278_v51, 2  ;;  %v2392_v53 = vrot.slane %v2391_v19, 2 }
 0xc91   :  { %v2262_v13 = vadd.f32 %v2261_v25, %v2260_v20  ;;  %v2375_v3 = vmax.f32 %v2373_v49, %v2374_v63  ;;  %v2267_v11 = vrot.slane %v2266_v31, 2  ;;  %v2380_v55 = vrot.slane %v2379_v59, 2 }
 0xc92   :  { %v2275_v26 = vrot.slane %v2274_v14, 1  ;;  %v2388_v24 = vrot.slane %v2387_v22, 1  ;;  %v2280_v58 = vadd.f32 %v2279_v17, %v2278_v51  ;;  %v2393_v42 = vmax.f32 %v2391_v19, %v2392_v53 }
 0xc93   :  { %v2263_v44 = vrot.slane %v2262_v13, 1  ;;  %v2376_v48 = vrot.slane %v2375_v3, 1  ;;  %v2268_v29 = vadd.f32 %v2267_v11, %v2266_v31  ;;  %v2381_v30 = vmax.f32 %v2379_v59, %v2380_v55 }
 0xc94   :  { %v2276_v60 = vadd.f32 %v2275_v26, %v2274_v14  ;;  %v2281_v35 = vrot.slane %v2280_v58, 1  ;;  %v2389_v33 = vmax.f32 %v2387_v22, %v2388_v24  ;;  %v2394_v5 = vrot.slane %v2393_v42, 1 }
 0xc95   :  { %v2264_v8 = vadd.f32 %v2263_v44, %v2262_v13  ;;  %v2377_v2 = vmax.f32 %v2375_v3, %v2376_v48  ;;  %v2269_v1 = vrot.slane %v2268_v29, 1  ;;  %v2382_v40 = vrot.slane %v2381_v30, 1  ;;  %v3072_v47 = vpop.f32.mrb[40].mxu1 }
 0xc96   :  { %v2338_v28 = vmul.f32 0.125, %v2276_v60  ;;  %v2197_v37 = vadd.f32 %v3072_v47, %v4170_v21  ;;  %v2188_v41 = vpop.f32.mrb[41].mxu1  ;;  %v2282_v50 = vadd.f32 %v2281_v35, %v2280_v58  ;;  %v2395_v45 = vmax.f32 %v2393_v42, %v2394_v5 }
 0xc97   :  { %v2336_v9 = vmul.f32 0.125, %v2264_v8  ;;  %v2270_v62 = vadd.f32 %v2269_v1, %v2268_v29  ;;  %v2383_v16 = vmax.f32 %v2381_v30, %v2382_v40  ;;  %v2189_v6 = vadd.f32 %v4170_v21, %v2188_v41  ;;  %v3073_v15 = vpop.f32.mrb[42].mxu1 }
 0xc98   :  { %v2229_v12 = vmax.f32 %v2197_v37, 0.0  ;;  %v2200_v34 = vadd.f32 %v3073_v15, %v4170_v21  ;;  %v2191_v36 = vpop.f32.mrb[43].mxu1  ;;  %v2502_v18 = vsel %vm2466_vm3, %v2377_v2, %v2501_v0  ;;  %v2339_v2 = vmul.f32 0.125, %v2282_v50 }
 0xc99   :  { %v2467_v61 = vsel %vm2466_vm3, %v2336_v9, %v2465_v38  ;;  %v2337_v32 = vmul.f32 0.125, %v2270_v62  ;;  %v2227_v54 = vmax.f32 %v2189_v6, 0.0  ;;  %v2192_v7 = vadd.f32 %v4170_v21, %v2191_v36 }
 0xc9a   :  { %v2295_v27 = vrot.slane %v2229_v12, 4  ;;  %v2230_v23 = vmax.f32 %v2200_v34, 0.0  ;;  %v2503_v52 = vsel %vm2468_vm4, %v2383_v16, %v2502_v18 }
 0xc9b   :  { %v2283_v43 = vrot.slane %v2227_v54, 4  ;;  %v2228_v56 = vmax.f32 %v2192_v7, 0.0  ;;  %v2504_v57 = vsel %vm2470_vm5, %v2389_v33, %v2503_v52  ;;  %v2469_v46 = vsel %vm2468_vm4, %v2337_v32, %v2467_v61 }
 0xc9c   :  { %v2296_v20 = vadd.f32 %v2295_v27, %v2229_v12  ;;  %v2409_v49 = vmax.f32 %v2229_v12, %v2295_v27  ;;  %v2301_v0 = vrot.slane %v2230_v23, 4  ;;  %v4196_v38 = vsel %vm2472_vm6, %v2395_v45, %v2504_v57 }
 0xc9d   :  { %v2284_v10 = vadd.f32 %v2283_v43, %v2227_v54  ;;  %v2397_v39 = vmax.f32 %v2227_v54, %v2283_v43  ;;  %v2289_v4 = vrot.slane %v2228_v56, 4  ;;  %v2471_v51 = vsel %vm2470_vm5, %v2338_v28, %v2469_v46 }
 0xc9e   :  { %v2297_v19 = vrot.slane %v2296_v20, 2  ;;  %v2410_v25 = vrot.slane %v2409_v49, 2  ;;  %v2302_v63 = vadd.f32 %v2301_v0, %v2230_v23  ;;  %v2415_v31 = vmax.f32 %v2230_v23, %v2301_v0 }
 0xc9f   :  { %v2285_v59 = vrot.slane %v2284_v10, 2  ;;  %v2398_v14 = vrot.slane %v2397_v39, 2  ;;  %v2290_v22 = vadd.f32 %v2289_v4, %v2228_v56  ;;  %v2403_v17 = vmax.f32 %v2228_v56, %v2289_v4 }
 0xca0   :  { %v2298_v53 = vadd.f32 %v2297_v19, %v2296_v20  ;;  %v2411_v13 = vmax.f32 %v2409_v49, %v2410_v25  ;;  %v2303_v3 = vrot.slane %v2302_v63, 2  ;;  %v2416_v11 = vrot.slane %v2415_v31, 2 }
 0xca1   :  { %v2286_v55 = vadd.f32 %v2285_v59, %v2284_v10  ;;  %v2399_v26 = vmax.f32 %v2397_v39, %v2398_v14  ;;  %v2291_v24 = vrot.slane %v2290_v22, 2  ;;  %v2404_v58 = vrot.slane %v2403_v17, 2 }
 0xca2   :  { %v2299_v42 = vrot.slane %v2298_v53, 1  ;;  %v2412_v44 = vrot.slane %v2411_v13, 1  ;;  %v2304_v48 = vadd.f32 %v2303_v3, %v2302_v63  ;;  %v2417_v29 = vmax.f32 %v2415_v31, %v2416_v11 }
 0xca3   :  { %v2287_v30 = vrot.slane %v2286_v55, 1  ;;  %v2400_v60 = vrot.slane %v2399_v26, 1  ;;  %v2292_v35 = vadd.f32 %v2291_v24, %v2290_v22  ;;  %v2405_v8 = vmax.f32 %v2403_v17, %v2404_v58 }
 0xca4   :  { %v2300_v1 = vadd.f32 %v2299_v42, %v2298_v53  ;;  %v2305_v40 = vrot.slane %v2304_v48, 1  ;;  %v2418_v47 = vrot.slane %v2417_v29, 1  ;;  %v2413_v28 = vmax.f32 %v2411_v13, %v2412_v44 }
 0xca5   :  { %v2288_v33 = vadd.f32 %v2287_v30, %v2286_v55  ;;  %v2293_v5 = vrot.slane %v2292_v35, 1  ;;  %v2406_v37 = vrot.slane %v2405_v8, 1  ;;  %v3076_v41 = vpop.f32.mrb[44].mxu1  ;;  %v2401_v62 = vmax.f32 %v2399_v26, %v2400_v60 }
 0xca6   :  { %v2342_v9 = vmul.f32 0.125, %v2300_v1  ;;  %v2306_v16 = vadd.f32 %v2305_v40, %v2304_v48  ;;  %v2213_v6 = vadd.f32 %v3076_v41, %v4170_v21  ;;  %v2204_v15 = vpop.f32.mrb[45].mxu1  ;;  %v2419_v12 = vmax.f32 %v2417_v29, %v2418_v47 }
 0xca7   :  { %v2294_v34 = vadd.f32 %v2293_v5, %v2292_v35  ;;  %v2407_v36 = vmax.f32 %v2405_v8, %v2406_v37  ;;  %v2205_v18 = vadd.f32 %v4170_v21, %v2204_v15  ;;  %v3077_v50 = vpop.f32.mrb[46].mxu1  ;;  %v2340_v61 = vmul.f32 0.125, %v2288_v33 }
 0xca8   :  { %v2233_v32 = vmax.f32 %v2213_v6, 0.0  ;;  %v2216_v54 = vadd.f32 %v3077_v50, %v4170_v21  ;;  %v2207_v7 = vpop.f32.mrb[47].mxu1  ;;  %v4203_v27 = vsel %vm2472_vm6, %v2339_v2, %v2471_v51  ;;  %v2343_v56 = vmul.f32 0.125, %v2306_v16 }
 0xca9   :  { %v2341_v23 = vmul.f32 0.125, %v2294_v34  ;;  %v2506_v45 = vsel %vm2460_vm0, %v2407_v36, %v2401_v62  ;;  %v2231_v52 = vmax.f32 %v2205_v18, 0.0  ;;  %v2208_v43 = vadd.f32 %v4170_v21, %v2207_v7 }
 0xcaa   :  { %v2319_v57 = vrot.slane %v2233_v32, 4  ;;  %v2234_v46 = vmax.f32 %v2216_v54, 0.0  ;;  %v2507_v20 = vsel %vm2462_vm1, %v2413_v28, %v2506_v45 }
 0xcab   :  { %v2474_v49 = vsel %vm2460_vm0, %v2341_v23, %v2340_v61  ;;  %v2307_v0 = vrot.slane %v2231_v52, 4  ;;  %v2232_v10 = vmax.f32 %v2208_v43, 0.0  ;;  %v2508_v39 = vsel %vm2464_vm2, %v2419_v12, %v2507_v20 }
 0xcac   :  { %v2475_v4 = vsel %vm2462_vm1, %v2342_v9, %v2474_v49  ;;  %v2320_v51 = vadd.f32 %v2319_v57, %v2233_v32  ;;  %v2433_v19 = vmax.f32 %v2233_v32, %v2319_v57  ;;  %v2325_v25 = vrot.slane %v2234_v46, 4 }
 0xcad   :  { %v2308_v63 = vadd.f32 %v2307_v0, %v2231_v52  ;;  %v2421_v31 = vmax.f32 %v2231_v52, %v2307_v0  ;;  %v2476_v21 = vsel %vm2464_vm2, %v2343_v56, %v2475_v4  ;;  %v2313_v59 = vrot.slane %v2232_v10, 4  ;;  %v2751_v0 = vld [vmem:[%s4245_s5] ss:$0 sm:$0xff] }
 0xcae   :  { %v2321_v14 = vrot.slane %v2320_v51, 2  ;;  %v2434_v22 = vrot.slane %v2433_v19, 2  ;;  %v2326_v17 = vadd.f32 %v2325_v25, %v2234_v46  ;;  %v2439_v53 = vmax.f32 %v2234_v46, %v2325_v25 }
 0xcaf   :  { %v2309_v13 = vrot.slane %v2308_v63, 2  ;;  %v2422_v3 = vrot.slane %v2421_v31, 2  ;;  %v2314_v11 = vadd.f32 %v2313_v59, %v2232_v10  ;;  %v2427_v55 = vmax.f32 %v2232_v10, %v2313_v59 }
 0xcb0   :  { %v2322_v26 = vadd.f32 %v2321_v14, %v2320_v51  ;;  %v2435_v24 = vmax.f32 %v2433_v19, %v2434_v22  ;;  %v2327_v58 = vrot.slane %v2326_v17, 2  ;;  %v2440_v42 = vrot.slane %v2439_v53, 2 }
 0xcb1   :  { %v2310_v44 = vadd.f32 %v2309_v13, %v2308_v63  ;;  %v2423_v48 = vmax.f32 %v2421_v31, %v2422_v3  ;;  %v2315_v29 = vrot.slane %v2314_v11, 2  ;;  %v2428_v30 = vrot.slane %v2427_v55, 2 }
 0xcb2   :  { %v2323_v60 = vrot.slane %v2322_v26, 1  ;;  %v2328_v35 = vadd.f32 %v2327_v58, %v2326_v17  ;;  %v2441_v8 = vmax.f32 %v2439_v53, %v2440_v42  ;;  %v2436_v28 = vrot.slane %v2435_v24, 1 }
 0xcb3   :  { %v2311_v2 = vrot.slane %v2310_v44, 1  ;;  %v2424_v1 = vrot.slane %v2423_v48, 1  ;;  %v2316_v40 = vadd.f32 %v2315_v29, %v2314_v11  ;;  %v2429_v47 = vmax.f32 %v2427_v55, %v2428_v30 }
 0xcb4   :  { %v2329_v33 = vrot.slane %v2328_v35, 1  ;;  %v2442_v5 = vrot.slane %v2441_v8, 1  ;;  %v2324_v16 = vadd.f32 %v2323_v60, %v2322_v26  ;;  %v2437_v18 = vmax.f32 %v2435_v24, %v2436_v28 }
 0xcb5   :  { %v2312_v37 = vadd.f32 %v2311_v2, %v2310_v44  ;;  %v2425_v41 = vmax.f32 %v2423_v48, %v2424_v1  ;;  %v2317_v9 = vrot.slane %v2316_v40, 1  ;;  %v2430_v62 = vrot.slane %v2429_v47, 1 }
 0xcb6   :  { %v2330_v6 = vadd.f32 %v2329_v33, %v2328_v35  ;;  %v2443_v32 = vmax.f32 %v2441_v8, %v2442_v5  ;;  %v2346_v7 = vmul.f32 0.125, %v2324_v16 }
 0xcb7   :  { %v2344_v15 = vmul.f32 0.125, %v2312_v37  ;;  %v2318_v12 = vadd.f32 %v2317_v9, %v2316_v40  ;;  %v2431_v34 = vmax.f32 %v2429_v47, %v2430_v62  ;;  %v2509_v36 = vsel %vm2466_vm3, %v2425_v41, %v2508_v39 }
 0xcb8   :  { %v2347_v45 = vmul.f32 0.125, %v2330_v6 }
 0xcb9   :  { %v2477_v50 = vsel %vm2466_vm3, %v2344_v15, %v2476_v21  ;;  %v2345_v61 = vmul.f32 0.125, %v2318_v12  ;;  %v2510_v54 = vsel %vm2468_vm4, %v2431_v34, %v2509_v36 }
 0xcba   :  { %v2511_v23 = vsel %vm2470_vm5, %v2437_v18, %v2510_v54 }
 0xcbb   :  { %v2512_v52 = vsel %vm2472_vm6, %v2443_v32, %v2511_v23  ;;  %v2478_v43 = vsel %vm2468_vm4, %v2345_v61, %v2477_v50 }
 0xcbc   :  { %v2516_v56 = vpack.c.bf16 %v2512_v52, %v4196_v38  ;;  %v2479_v57 = vsel %vm2470_vm5, %v2346_v7, %v2478_v43 }
 0xcbd   :  { %v2480_v46 = vsel %vm2472_vm6, %v2347_v45, %v2479_v57 }
 0xcbe   :  { %2684 = vmatprep.mubr.bf16.mxu0 %v2516_v56  ;;  %v2515_v20 = vpack.c.bf16 %v2480_v46, %v4203_v27 }
 0xcc0   :  { %2685 = vmatmul.mubr.bf16.vlgmr.msra.gmra.mrb[48].mxu0 %v2515_v20 }
 0xd93   :  { %v2880_v49 = vpop.f32.mrb[48].mxu0 }
 0xd94   :  { %v2881_v10 = vpop.f32.mrb[49].mxu0 }
 0xd95   :  { %v2882_v39 = vadd.f32 %v2881_v10, %v2880_v49  ;;  %v2883_v4 = vpop.f32.mrb[50].mxu0 }
 0xd96   :  { %v2884_v51 = vpop.f32.mrb[51].mxu0 }
 0xd97   :  { %v2687_v38 = vadd.f32 %v2882_v39, %v2751_v0  ;;  %v2885_v19 = vadd.f32 %v2884_v51, %v2883_v4 }
 0xd99   :  { %2693 = vst [vmem:[#allocation10] sm:$0xff] %v2687_v38  ;;  %v2690_v25 = vadd.f32 %v2885_v19, %v2751_v0 }
 0xd9b   :  { %2694 = vst [vmem:[#allocation10 + $0x8] sm:$0xff] %v2690_v25 }
 0xd9c   :  { %3445 = shalt.err (!%p3442_p8)
}
 0xd9d   :  { %s3446_s11 = scalar_lea.hbm %s4246_s6, 256 }
 0xd9e   :  { %p3447_p9 = scmp.ne.s32.totalorder %s4246_s6, %s3446_s11  ;;  %p3450_p10 = scmp.lt.u32.totalorder %s3446_s11, %s4246_s6 }
 0xda0   :  { %p3452_p11 = pnand %p3450_p10, %p3447_p9 }
 0xda2   :  { %3455 = shalt.err (!%p3452_p11)
}
 0xda3   :  { %2706 = dma.vmem_to_hbm [thread:$0]  %s2701_s30, 256, %s4246_s6, [#allocation4], %s3465_s7, %s3465_s7, %s3466_s8  }
 0xda4   :  { %3462 = dma.done.wait [#allocation4], 256  }
 0xda5   :  { %3463 = vsyncadd [#allocation4], 4294967040 }
 0xda6   :  { %2710 = vsyncpa [#allocation3], 1 }
 0xda7   :  { %2711 = vsyncpa [#allocation6], 1 }
 0xda8   :  { %2712 = vsyncpa [#allocation9], 1 }
 0xda9   :  { %2713 = vsyncpa [#allocation4], 1 }

</bundles_post_ra>
